<compile_context>
chip_gen: v5e
topology: v5e:2x2
jax: 0.10.0
libtpu: 0.0.40
codegen_flags: <defaults>
</compile_context>

<pallas_src>
import functools
import math

import jax
import jax.numpy as jnp
from jax.experimental import pallas as pl
from jax.experimental.pallas import tpu as pltpu


def _rmsnorm_kernel(x_ref, w_ref, o_ref, *, eps, inv_d, x_dtype):
    # x_ref: (TM, Dp) token tile; w_ref: (1, Dp) VMEM-resident scale; o_ref: (TM, Dp)
    x = x_ref[...].astype(jnp.float32)                      # f32 compute (VPU)
    ss = jnp.sum(x * x, axis=-1, keepdims=True)             # (TM,1) cross-lane reduce (XLU)
    inv = jax.lax.rsqrt(ss * inv_d + eps)                   # EUP rsqrt, 1/D folded in
    normed = (x * inv).astype(x_dtype)                      # .type_as(x)
    o_ref[...] = (normed * w_ref[...]).astype(o_ref.dtype)  # * weight (promoted dtype)


def _block_spec(shape, index_map, n_buffers):
    # Deeper pipelining only when requested; fall back gracefully if this jax
    # version's BlockSpec has no pipeline_mode kwarg.
    if n_buffers > 2:
        try:
            return pl.BlockSpec(shape, index_map, pipeline_mode=pl.Buffered(n_buffers))
        except TypeError:
            pass
    return pl.BlockSpec(shape, index_map)


def rms_norm(x, weight, *, eps=1e-6):
    """x: (..., D); weight: (D,). Same semantics as llama2 RMSNorm.forward."""
    orig_shape = x.shape
    D = orig_shape[-1]
    x_dtype = x.dtype
    out_dtype = jnp.promote_types(x_dtype, weight.dtype)    # torch: norm.type_as(x) * weight
    T = int(math.prod(orig_shape[:-1])) if len(orig_shape) > 1 else 1
    x2d = x.reshape(T, D)

    # Lane density: pad last dim to a multiple of 128. Zero padding does not
    # change sum(x^2); 1/D below uses the original D.
    Dp = ((D + 127) // 128) * 128
    if Dp != D:
        x2d = jnp.pad(x2d, ((0, 0), (0, Dp - D)))
        w = jnp.pad(weight, (0, Dp - D))
    else:
        w = weight
    w2d = w.astype(out_dtype).reshape(1, Dp)

    in_itemsize = x2d.dtype.itemsize
    out_itemsize = jnp.dtype(out_dtype).itemsize

    # Generation-aware VMEM budget (v5e/v6e: 128 MiB, v7x: 64 MiB physical).
    try:
        phys_vmem = int(pltpu.get_tpu_info().vmem_capacity_bytes)
    except Exception:
        phys_vmem = 64 << 20  # conservative (v7x)
    budget = min(phys_vmem // 2, 32 << 20)

    # Per-token VMEM working set: double-buffered input + output blocks plus
    # ~3 materialized f32 temporaries (x_f32, x*x, x*inv).
    per_token = Dp * (2 * in_itemsize + 2 * out_itemsize + 3 * 4)

    # Target ~2 MiB x-blocks (measured HBM-roofline knee), 16-row aligned,
    # capped by the VMEM budget and by 1024 rows.
    tm = max((2 << 20) // (Dp * in_itemsize), 16)
    tm = min(tm, max(budget // per_token, 16))
    tm = min(tm, 1024)
    tm = max(16, (tm // 16) * 16)
    if tm >= T:
        tm = T
    grid_steps = pl.cdiv(T, tm)

    # If the budget forces a small block on a long grid, deepen pipelining so
    # fixed per-step DMA issue latency stays hidden.
    n_buffers = 3 if (tm * Dp * in_itemsize < (1 << 20) and grid_steps >= 3) else 2

    # Scoped-VMEM limit from the actual working set (+ headroom), never > physical.
    working_set = (n_buffers * tm * Dp * (in_itemsize + out_itemsize)
                   + 3 * tm * Dp * 4 + 2 * Dp * out_itemsize)
    vmem_limit = int(min(phys_vmem, max(working_set + (4 << 20), 16 << 20)))

    cost = pl.CostEstimate(
        flops=4 * T * Dp,                                   # square, reduce, scale, weight-mul
        transcendentals=T,                                  # one rsqrt per row
        bytes_accessed=T * Dp * (in_itemsize + out_itemsize) + Dp * out_itemsize,
    )

    kernel = functools.partial(_rmsnorm_kernel, eps=float(eps),
                               inv_d=1.0 / float(D), x_dtype=x_dtype)

    out2d = pl.pallas_call(
        kernel,
        out_shape=jax.ShapeDtypeStruct((T, Dp), out_dtype),
        grid_spec=pltpu.PrefetchScalarGridSpec(
            num_scalar_prefetch=0,
            grid=(grid_steps,),
            in_specs=[
                _block_spec((tm, Dp), lambda i: (i, 0), n_buffers),  # x tile (pipelined)
                pl.BlockSpec((1, Dp), lambda i: (0, 0)),             # weight: constant block,
                                                                     # stays VMEM-resident
            ],
            out_specs=_block_spec((tm, Dp), lambda i: (i, 0), n_buffers),
        ),
        compiler_params=pltpu.CompilerParams(
            # On v7x, pltpu.CORE_PARALLEL would shard this axis explicitly across
            # both TensorCores; "parallel" is the portable choice (no-op on 1-TC chips).
            dimension_semantics=("parallel",),
            vmem_limit_bytes=vmem_limit,
        ),
        cost_estimate=cost,
    )(x2d, w2d)

    if Dp != D:
        out2d = out2d[:, :D]
    return out2d.reshape(orig_shape)


def reference(x, weight, eps):
    xf = x.astype(jnp.float32)
    inv = jax.lax.rsqrt(jnp.mean(xf * xf, axis=-1, keepdims=True) + eps)
    normed = (xf * inv).astype(x.dtype)    # .type_as(x)
    return normed * weight                 # promotes like torch


if __name__ == "__main__":
    key = jax.random.PRNGKey(0)
    k1, k2, k3, k4 = jax.random.split(key, 4)
    eps = 1e-6  # llama2 default

    # Case 1: batch=2, seq=256, dim=128, f32 — lane-dense, byte-sized tile covers it.
    x1 = jax.random.normal(k1, (2, 256, 128), dtype=jnp.float32)
    w1 = 1.0 + 0.1 * jax.random.normal(k2, (128,), dtype=jnp.float32)
    y1 = jax.block_until_ready(rms_norm(x1, w1, eps=eps))
    r1 = reference(x1, w1, eps)
    assert y1.shape == x1.shape and y1.dtype == x1.dtype
    assert jnp.allclose(y1, r1, atol=1e-5, rtol=1e-5)

    # Case 2: bf16 activations, f32 weight, dim=96 (padded to 128), T=1200 (>1 tile
    # with a partial last tile) — exercises padding, partial tiles and dtype promotion.
    x2 = jax.random.normal(k3, (4, 300, 96), dtype=jnp.bfloat16)
    w2 = 1.0 + 0.1 * jax.random.normal(k4, (96,), dtype=jnp.float32)
    y2 = jax.block_until_ready(rms_norm(x2, w2, eps=eps))
    r2 = reference(x2, w2, eps)
    assert y2.shape == x2.shape and y2.dtype == jnp.float32  # promoted, like torch
    assert jnp.allclose(y2, r2, atol=1e-2, rtol=2e-2)

    print("KERNEL_OK")
</pallas_src>

<mosaic_0001>
module attributes {stable_mosaic.version = 11 : i64} {
  func.func @_rmsnorm_kernel(%arg0: i32, %arg1: memref<512x128xf32, #tpu.memory_space<vmem>>, %arg2: memref<1x128xf32, #tpu.memory_space<vmem>>, %arg3: memref<512x128xf32, #tpu.memory_space<vmem>>) attributes {dimension_semantics = [#tpu.dimension_semantics<parallel>], iteration_bounds = array<i64: 1>, scalar_prefetch = 0 : i64, scratch_operands = 0 : i64, tpu.core_type = #tpu.core_type<tc>, window_params = [{transform_indices = @transform_0, window_bounds = array<i64: 512, 128>}, {pipeline_mode = #tpu.pipeline_mode<synchronous>, transform_indices = @transform_1, window_bounds = array<i64: 1, 128>}, {transform_indices = @transform_2, window_bounds = array<i64: 512, 128>}]} {
    %c0 = arith.constant 0 : index
    %c0_0 = arith.constant 0 : index
    %0 = vector.load %arg1[%c0, %c0_0] : memref<512x128xf32, #tpu.memory_space<vmem>>, vector<512x128xf32>
    %1 = arith.mulf %0, %0 : vector<512x128xf32>
    %cst = arith.constant dense<0.000000e+00> : vector<512xf32>
    %2 = vector.multi_reduction <add>, %1, %cst [1] : vector<512x128xf32> to vector<512xf32>
    %3 = vector.shape_cast %2 : vector<512xf32> to vector<512x1xf32>
    %cst_1 = arith.constant 7.812500e-03 : f32
    %4 = vector.broadcast %cst_1 : f32 to vector<512x1xf32>
    %5 = arith.mulf %3, %4 : vector<512x1xf32>
    %cst_2 = arith.constant 9.99999997E-7 : f32
    %6 = vector.broadcast %cst_2 : f32 to vector<512x1xf32>
    %7 = arith.addf %5, %6 : vector<512x1xf32>
    %8 = math.rsqrt %7 : vector<512x1xf32>
    %9 = vector.broadcast %8 : vector<512x1xf32> to vector<512x128xf32>
    %10 = arith.mulf %0, %9 : vector<512x128xf32>
    %c0_3 = arith.constant 0 : index
    %c0_4 = arith.constant 0 : index
    %11 = vector.load %arg2[%c0_3, %c0_4] : memref<1x128xf32, #tpu.memory_space<vmem>>, vector<1x128xf32>
    %12 = vector.broadcast %11 : vector<1x128xf32> to vector<512x128xf32>
    %13 = arith.mulf %10, %12 : vector<512x128xf32>
    %c0_5 = arith.constant 0 : index
    %c0_6 = arith.constant 0 : index
    %14 = vector.load %arg3[%c0_5, %c0_6] : memref<512x128xf32, #tpu.memory_space<vmem>>, vector<512x128xf32>
    tpu.vector_store %arg3[%c0_5, %c0_6], %13 {strides = array<i32>} : memref<512x128xf32, #tpu.memory_space<vmem>>, vector<512x128xf32>,
    return
  }
  func.func @transform_0(%arg0: i32) -> (i32, i32) {
    %c0_i32 = arith.constant 0 : i32
    %c0_i32_0 = arith.constant 0 : i32
    return %arg0, %c0_i32 : i32, i32
  }
  func.func @transform_1(%arg0: i32) -> (i32, i32) {
    %c0_i32 = arith.constant 0 : i32
    %c0_i32_0 = arith.constant 0 : i32
    %c0_i32_1 = arith.constant 0 : i32
    return %c0_i32, %c0_i32_0 : i32, i32
  }
  func.func @transform_2(%arg0: i32) -> (i32, i32) {
    %c0_i32 = arith.constant 0 : i32
    %c0_i32_0 = arith.constant 0 : i32
    return %arg0, %c0_i32 : i32, i32
  }
}

</mosaic_0001>

<bundles_post_ra>
// kernel: tpu_custom_call.1
= control target key start
LH: loop header
LB: loop body
LE: loop exit
PB: predicated region body
PF: predicated region fallthrough
CT: control target
= control target key end

     0   :  { %7 = vsyncpa [#allocation3], 0  ;;  %s2790_s0 = inlined_call_operand.hbm [shape: f32[512,128], index: 0, kind: input, shape index: {}]   ;;  %s2791_s1 = inlined_call_operand.hbm [shape: f32[1,128], index: 1, kind: input, shape index: {}]   ;;  %s2792_s2 = inlined_call_operand.hbm [shape: f32[512,128], index: 2, kind: output, shape index: {}]  }
   0x1   :  { %8 = vsyncpa [#allocation6], 0 }
   0x2   :  { %9 = vsyncpa [#allocation4], 0  ;;  %s14_s11 = sshll.u32 %s2790_s0, 4  ;;  %s1541_s12 = smov [#allocation2]   ;;  %s15_s11 = int_to_ptr.hbm [resolvable:$true] %s14_s11 }
   0x3   :  { %s16_s13 = sshll.u32 %s1541_s12, 4  ;;  %s28_s16 = sshll.u32 %s2791_s1, 4  ;;  %s17_s13 = int_to_ptr.vmem [resolvable:$true] %s16_s13  ;;  %s29_s16 = int_to_ptr.hbm [resolvable:$true] %s28_s16 }
   0x4   :  { %s1542_s17 = smov 128   ;;  %s1543_s18 = smov 8  }
   0x5   :  { %22 = dma.hbm_to_vmem [thread:$0]  %s15_s11, 8192, %s17_s13, [#allocation3], %s1542_s17, %s1542_s17, %s1543_s18  }
   0x6   :  { %s1544_s19 = smov [#allocation5]  }
   0x7   :  { %s30_s20 = sshll.u32 %s1544_s19, 4  ;;  %s31_s20 = int_to_ptr.vmem [resolvable:$true] %s30_s20 }
   0x8   :  { %33 = dma.hbm_to_vmem [thread:$0]  %s29_s16, 16, %s31_s20, [#allocation6]  }
   0x9   :  { %1535 = dma.done.wait [#allocation3], 8192  }
   0xa   :  { %1536 = vsyncadd [#allocation3], 4294959104 }
   0xb   :  { %1537 = dma.done.wait [#allocation6], 16  }
   0xc   :  { %1538 = vsyncadd [#allocation6], 4294967280  ;;  %v1570_v0 = vld [vmem:[#allocation2 + $0x20] sm:$0xff]  ;;  %v1572_v1 = vld [vmem:[#allocation2 + $0x10] sm:$0xff]  ;;  %s1545_s0 = smov [#allocation7]   ;;  %s1268_s23 = sshll.u32 %s2792_s2, 4  ;;  %s1269_s23 = int_to_ptr.hbm [resolvable:$true] %s1268_s23 }
   0xd   :  { %v1574_v2 = vld [vmem:[#allocation2] sm:$0xff]  ;;  %v110_v3 = vmul.f32 %v1570_v0, %v1570_v0  ;;  %v108_v4 = vmul.f32 %v1572_v1, %v1572_v1  ;;  %v1582_v6 = vld [vmem:[#allocation2 + $0x28] sm:$0xff]  ;;  %v1584_v7 = vld [vmem:[#allocation2 + $0x18] sm:$0xff]  ;;  %s1266_s1 = sshll.u32 %s1545_s0, 4  ;;  %s1267_s1 = int_to_ptr.vmem [resolvable:$true] %s1266_s1 }
   0xe   :  { %v106_v5 = vmul.f32 %v1574_v2, %v1574_v2  ;;  %v1586_v8 = vld [vmem:[#allocation2 + $0x8] sm:$0xff]  ;;  %v111_v9 = vmul.f32 %v1582_v6, %v1582_v6  ;;  %v109_v10 = vmul.f32 %v1584_v7, %v1584_v7  ;;  %v1594_v12 = vld [vmem:[#allocation2 + $0x40] sm:$0xff]  ;;  %v1596_v13 = vld [vmem:[#allocation2 + $0x38] sm:$0xff] }
   0xf   :  { %178 = vadd.xlane.f32.xlu2 %v110_v3  ;;  %174 = vadd.xlane.f32.xlu1 %v108_v4  ;;  %v107_v11 = vmul.f32 %v1586_v8, %v1586_v8  ;;  %v1598_v14 = vld [vmem:[#allocation2 + $0x30] sm:$0xff]  ;;  %v114_v15 = vmul.f32 %v1594_v12, %v1594_v12  ;;  %v113_v16 = vmul.f32 %v1596_v13, %v1596_v13  ;;  %v1606_v18 = vld [vmem:[#allocation2 + $0x58] sm:$0xff]  ;;  %v1610_v20 = vld [vmem:[#allocation2 + $0x48] sm:$0xff] }
  0x10   :  { %170 = vadd.xlane.f32.xlu0 %v106_v5  ;;  %v112_v17 = vmul.f32 %v1598_v14, %v1598_v14  ;;  %v1608_v19 = vld [vmem:[#allocation2 + $0x50] sm:$0xff]  ;;  %v117_v21 = vmul.f32 %v1606_v18, %v1606_v18  ;;  %v115_v23 = vmul.f32 %v1610_v20, %v1610_v20  ;;  %v1620_v25 = vld [vmem:[#allocation2 + $0x68] sm:$0xff]  ;;  %v1622_v26 = vld [vmem:[#allocation2 + $0x60] sm:$0xff] }
  0x11   :  { %v116_v22 = vmul.f32 %v1608_v19, %v1608_v19  ;;  %v1618_v24 = vld [vmem:[#allocation2 + $0x70] sm:$0xff]  ;;  %v119_v28 = vmul.f32 %v1620_v25, %v1620_v25  ;;  %v118_v29 = vmul.f32 %v1622_v26, %v1622_v26  ;;  %v1630_v30 = vld [vmem:[#allocation2 + $0x88] sm:$0xff]  ;;  %v1632_v31 = vld [vmem:[#allocation2 + $0x80] sm:$0xff] }
  0x12   :  { %v120_v27 = vmul.f32 %v1618_v24, %v1618_v24  ;;  %v1634_v32 = vld [vmem:[#allocation2 + $0x78] sm:$0xff]  ;;  %v123_v33 = vmul.f32 %v1630_v30, %v1630_v30  ;;  %v122_v34 = vmul.f32 %v1632_v31, %v1632_v31  ;;  %v1642_v36 = vld [vmem:[#allocation2 + $0xa0] sm:$0xff]  ;;  %v60_v38 = vld [vmem:[#allocation2 + $0x90] sm:$0xff] }
  0x13   :  { %v121_v35 = vmul.f32 %v1634_v32, %v1634_v32  ;;  %v61_v37 = vld [vmem:[#allocation2 + $0x98] sm:$0xff]  ;;  %v126_v39 = vmul.f32 %v1642_v36, %v1642_v36  ;;  %v124_v41 = vmul.f32 %v60_v38, %v60_v38  ;;  %v64_v43 = vld [vmem:[#allocation2 + $0xb0] sm:$0xff]  ;;  %v63_v44 = vld [vmem:[#allocation2 + $0xa8] sm:$0xff] }
  0x14   :  { %v125_v40 = vmul.f32 %v61_v37, %v61_v37  ;;  %v65_v42 = vld [vmem:[#allocation2 + $0xb8] sm:$0xff]  ;;  %v128_v46 = vmul.f32 %v64_v43, %v64_v43  ;;  %v127_v47 = vmul.f32 %v63_v44, %v63_v44  ;;  %v68_v48 = vld [vmem:[#allocation2 + $0xd0] sm:$0xff]  ;;  %v67_v49 = vld [vmem:[#allocation2 + $0xc8] sm:$0xff] }
  0x15   :  { %v129_v45 = vmul.f32 %v65_v42, %v65_v42  ;;  %v66_v50 = vld [vmem:[#allocation2 + $0xc0] sm:$0xff]  ;;  %v132_v51 = vmul.f32 %v68_v48, %v68_v48  ;;  %v131_v52 = vmul.f32 %v67_v49, %v67_v49  ;;  %v71_v54 = vld [vmem:[#allocation2 + $0xe8] sm:$0xff]  ;;  %v69_v56 = vld [vmem:[#allocation2 + $0xd8] sm:$0xff] }
  0x16   :  { %v130_v53 = vmul.f32 %v66_v50, %v66_v50  ;;  %v70_v55 = vld [vmem:[#allocation2 + $0xe0] sm:$0xff]  ;;  %v135_v57 = vmul.f32 %v71_v54, %v71_v54  ;;  %v133_v59 = vmul.f32 %v69_v56, %v69_v56  ;;  %v73_v61 = vld [vmem:[#allocation2 + $0xf8] sm:$0xff]  ;;  %v72_v62 = vld [vmem:[#allocation2 + $0xf0] sm:$0xff] }
  0x17   :  { %180 = vadd.xlane.f32.xlu2 %v111_v9  ;;  %176 = vadd.xlane.f32.xlu1 %v109_v10  ;;  %v134_v58 = vmul.f32 %v70_v55, %v70_v55  ;;  %v74_v60 = vld [vmem:[#allocation2 + $0x100] sm:$0xff]  ;;  %v137_v3 = vmul.f32 %v73_v61, %v73_v61  ;;  %v136_v4 = vmul.f32 %v72_v62, %v72_v62  ;;  %v77_v5 = vld [vmem:[#allocation2 + $0x118] sm:$0xff]  ;;  %v76_v9 = vld [vmem:[#allocation2 + $0x110] sm:$0xff] }
  0x18   :  { %172 = vadd.xlane.f32.xlu0 %v107_v11  ;;  %v138_v63 = vmul.f32 %v74_v60, %v74_v60  ;;  %v75_v10 = vld [vmem:[#allocation2 + $0x108] sm:$0xff]  ;;  %v141_v11 = vmul.f32 %v77_v5, %v77_v5  ;;  %v92_v60 = vld [vmem:[#allocation2 + $0x190] sm:$0xff]  ;;  %v90_v62 = vld [vmem:[#allocation2 + $0x180] sm:$0xff] }
  0x19   :  { %v91_v61 = vld [vmem:[#allocation2 + $0x188] sm:$0xff] }
  0x1f   :  { %186 = vadd.xlane.f32.xlu2 %v114_v15  ;;  %184 = vadd.xlane.f32.xlu1 %v113_v16  ;;  %v140_v15 = vmul.f32 %v76_v9, %v76_v9  ;;  %v139_v16 = vmul.f32 %v75_v10, %v75_v10 }
  0x20   :  { %182 = vadd.xlane.f32.xlu0 %v112_v17  ;;  %v80_v17 = vld [vmem:[#allocation2 + $0x130] sm:$0xff] }
  0x27   :  { %192 = vadd.xlane.f32.xlu2 %v117_v21  ;;  %190 = vadd.xlane.f32.xlu1 %v116_v22  ;;  %v79_v21 = vld [vmem:[#allocation2 + $0x128] sm:$0xff]  ;;  %v78_v22 = vld [vmem:[#allocation2 + $0x120] sm:$0xff] }
  0x28   :  { %188 = vadd.xlane.f32.xlu0 %v115_v23  ;;  %v144_v23 = vmul.f32 %v80_v17, %v80_v17  ;;  %v93_v17 = vld [vmem:[#allocation2 + $0x198] sm:$0xff] }
  0x2f   :  { %198 = vadd.xlane.f32.xlu2 %v120_v27  ;;  %196 = vadd.xlane.f32.xlu1 %v119_v28  ;;  %v143_v27 = vmul.f32 %v79_v21, %v79_v21  ;;  %v142_v28 = vmul.f32 %v78_v22, %v78_v22  ;;  %v154_v22 = vmul.f32 %v90_v62, %v90_v62 }
  0x30   :  { %194 = vadd.xlane.f32.xlu0 %v118_v29  ;;  %v83_v29 = vld [vmem:[#allocation2 + $0x148] sm:$0xff] }
  0x37   :  { %204 = vadd.xlane.f32.xlu2 %v123_v33  ;;  %202 = vadd.xlane.f32.xlu1 %v122_v34  ;;  %v82_v33 = vld [vmem:[#allocation2 + $0x140] sm:$0xff]  ;;  %v81_v34 = vld [vmem:[#allocation2 + $0x138] sm:$0xff] }
  0x38   :  { %200 = vadd.xlane.f32.xlu0 %v121_v35  ;;  %v147_v35 = vmul.f32 %v83_v29, %v83_v29  ;;  %v146_v37 = vmul.f32 %v82_v33, %v82_v33  ;;  %v145_v38 = vmul.f32 %v81_v34, %v81_v34 }
  0x3f   :  { %210 = vadd.xlane.f32.xlu2 %v126_v39  ;;  %208 = vadd.xlane.f32.xlu1 %v125_v40  ;;  %v86_v39 = vld [vmem:[#allocation2 + $0x160] sm:$0xff]  ;;  %v85_v40 = vld [vmem:[#allocation2 + $0x158] sm:$0xff] }
  0x40   :  { %206 = vadd.xlane.f32.xlu0 %v124_v41  ;;  %v84_v41 = vld [vmem:[#allocation2 + $0x150] sm:$0xff]  ;;  %v150_v42 = vmul.f32 %v86_v39, %v86_v39  ;;  %v149_v43 = vmul.f32 %v85_v40, %v85_v40  ;;  %v157_v40 = vmul.f32 %v93_v17, %v93_v17 }
  0x41   :  { %v148_v44 = vmul.f32 %v84_v41, %v84_v41  ;;  %v96_v41 = vld [vmem:[#allocation2 + $0x1b0] sm:$0xff] }
  0x47   :  { %216 = vadd.xlane.f32.xlu2 %v129_v45  ;;  %214 = vadd.xlane.f32.xlu1 %v128_v46  ;;  %v89_v45 = vld [vmem:[#allocation2 + $0x178] sm:$0xff]  ;;  %v88_v46 = vld [vmem:[#allocation2 + $0x170] sm:$0xff] }
  0x48   :  { %212 = vadd.xlane.f32.xlu0 %v127_v47  ;;  %v87_v47 = vld [vmem:[#allocation2 + $0x168] sm:$0xff]  ;;  %v152_v54 = vmul.f32 %v88_v46, %v88_v46 }
  0x49   :  { %v151_v56 = vmul.f32 %v87_v47, %v87_v47 }
  0x4f   :  { %222 = vadd.xlane.f32.xlu2 %v132_v51  ;;  %220 = vadd.xlane.f32.xlu1 %v131_v52 }
  0x50   :  { %218 = vadd.xlane.f32.xlu0 %v130_v53  ;;  %v153_v53 = vmul.f32 %v89_v45, %v89_v45 }
  0x57   :  { %228 = vadd.xlane.f32.xlu2 %v135_v57  ;;  %226 = vadd.xlane.f32.xlu1 %v134_v58 }
  0x58   :  { %224 = vadd.xlane.f32.xlu0 %v133_v59 }
  0x5f   :  { %234 = vadd.xlane.f32.xlu2 %v138_v63  ;;  %232 = vadd.xlane.f32.xlu1 %v137_v3 }
  0x60   :  { %230 = vadd.xlane.f32.xlu0 %v136_v4  ;;  %v95_v4 = vld [vmem:[#allocation2 + $0x1a8] sm:$0xff] }
  0x61   :  { %v159_v34 = vmul.f32 %v95_v4, %v95_v4 }
  0x67   :  { %240 = vadd.xlane.f32.xlu2 %v141_v11  ;;  %238 = vadd.xlane.f32.xlu1 %v140_v15  ;;  %v156_v11 = vmul.f32 %v92_v60, %v92_v60  ;;  %v155_v15 = vmul.f32 %v91_v61, %v91_v61 }
  0x68   :  { %236 = vadd.xlane.f32.xlu0 %v139_v16  ;;  %v94_v16 = vld [vmem:[#allocation2 + $0x1a0] sm:$0xff] }
  0x69   :  { %v158_v39 = vmul.f32 %v94_v16, %v94_v16 }
  0x6f   :  { %246 = vadd.xlane.f32.xlu2 %v144_v23  ;;  %244 = vadd.xlane.f32.xlu1 %v143_v27  ;;  %v98_v23 = vld [vmem:[#allocation2 + $0x1c0] sm:$0xff]  ;;  %v97_v27 = vld [vmem:[#allocation2 + $0x1b8] sm:$0xff] }
  0x70   :  { %242 = vadd.xlane.f32.xlu0 %v142_v28  ;;  %v1674_v45 = vmul.f32 %v97_v27, %v97_v27 }
  0x77   :  { %252 = vadd.xlane.f32.xlu2 %v147_v35  ;;  %250 = vadd.xlane.f32.xlu1 %v146_v37 }
  0x78   :  { %248 = vadd.xlane.f32.xlu0 %v145_v38 }
  0x7f   :  { %258 = vadd.xlane.f32.xlu2 %v150_v42  ;;  %256 = vadd.xlane.f32.xlu1 %v149_v43 }
  0x80   :  { %254 = vadd.xlane.f32.xlu0 %v148_v44  ;;  %v1672_v44 = vmul.f32 %v98_v23, %v98_v23  ;;  %v1708_v23 = vld [vmem:[#allocation5] ss:$0 sm:$0xff] }
  0x82   :  { %v179_v48 = vpop.xlane.xlu2 %178  ;;  %v175_v49 = vpop.xlane.xlu1 %174 }
  0x83   :  { %v302_v50 = vmul.f32 0.0078125, %v179_v48  ;;  %v300_v51 = vmul.f32 0.0078125, %v175_v49  ;;  %v171_v52 = vpop.xlane.xlu0 %170  ;;  %v101_v48 = vld [vmem:[#allocation2 + $0x1d8] sm:$0xff] }
  0x84   :  { %v298_v55 = vmul.f32 0.0078125, %v171_v52  ;;  %v1689_v62 = vmul.f32 %v101_v48, %v101_v48 }
  0x85   :  { %v1646_v57 = vadd.f32 1e-06, %v302_v50  ;;  %v1648_v58 = vadd.f32 1e-06, %v300_v51  ;;  %v1684_v50 = vmul.f32 %v96_v41, %v96_v41 }
  0x86   :  { %v1650_v59 = vadd.f32 1e-06, %v298_v55 }
  0x87   :  { %1288 = vrsqrt.f32 %v1646_v57  ;;  %264 = vadd.xlane.f32.xlu2 %v153_v53  ;;  %262 = vadd.xlane.f32.xlu1 %v152_v54  ;;  %vm472_vm0 = vweird.f32 %v1646_v57  ;;  %vm452_vm1 = vweird.f32 %v1648_v58 }
  0x88   :  { %1290 = vrsqrt.f32 %v1648_v58  ;;  %260 = vadd.xlane.f32.xlu0 %v151_v56  ;;  %vm432_vm3 = vweird.f32 %v1650_v59 }
  0x89   :  { %1292 = vrsqrt.f32 %v1650_v59 }
  0x8a   :  { %v181_v63 = vpop.xlane.xlu2 %180  ;;  %v177_v3 = vpop.xlane.xlu1 %176 }
  0x8b   :  { %v303_v5 = vmul.f32 0.0078125, %v181_v63  ;;  %v301_v9 = vmul.f32 0.0078125, %v177_v3  ;;  %v173_v10 = vpop.xlane.xlu0 %172  ;;  %v100_v63 = vld [vmem:[#allocation2 + $0x1d0] sm:$0xff] }
  0x8c   :  { %v299_v21 = vmul.f32 0.0078125, %v173_v10 }
  0x8d   :  { %v1655_v28 = vpop.eup %1288  ;;  %v1657_v29 = vadd.f32 1e-06, %v303_v5  ;;  %v1659_v33 = vadd.f32 1e-06, %v301_v9 }
  0x8e   :  { %v1661_v35 = vpop.eup %1290  ;;  %v467_v37 = vmul.f32 %v1655_v28, %v1646_v57  ;;  %v1665_v38 = vadd.f32 1e-06, %v299_v21  ;;  %vm473_vm2 = vweird.f32 %v1655_v28  ;;  %v1704_v21 = vmul.f32 %v100_v63, %v100_v63 }
  0x8f   :  { %v1667_v42 = vpop.eup %1292  ;;  %v447_v43 = vmul.f32 %v1661_v35, %v1648_v58  ;;  %1294 = vrsqrt.f32 %v1657_v29  ;;  %270 = vadd.xlane.f32.xlu2 %v156_v11  ;;  %268 = vadd.xlane.f32.xlu1 %v155_v15  ;;  %vm453_vm4 = vweird.f32 %v1661_v35  ;;  %vm482_vm5 = vweird.f32 %v1657_v29  ;;  %vm474_vm8 = vmor %vm472_vm0, %vm473_vm2 }
  0x90   :  { %v468_v46 = vmul.f32 %v1655_v28, %v467_v37  ;;  %v427_v47 = vmul.f32 %v1667_v42, %v1650_v59  ;;  %1296 = vrsqrt.f32 %v1659_v33  ;;  %266 = vadd.xlane.f32.xlu0 %v154_v22  ;;  %vm433_vm6 = vweird.f32 %v1667_v42  ;;  %vm454_vm9 = vmor %vm452_vm1, %vm453_vm4 }
  0x91   :  { %v448_v49 = vmul.f32 %v1661_v35, %v447_v43  ;;  %1298 = vrsqrt.f32 %v1665_v38  ;;  %vm462_vm7 = vweird.f32 %v1659_v33  ;;  %vm442_vm10 = vweird.f32 %v1665_v38  ;;  %vm434_vm11 = vmor %vm432_vm3, %vm433_vm6 }
  0x92   :  { %v469_v51 = vmul.f32 0.5, %v468_v46  ;;  %v428_v52 = vmul.f32 %v1667_v42, %v427_v47  ;;  %v187_v53 = vpop.xlane.xlu2 %186  ;;  %v185_v54 = vpop.xlane.xlu1 %184 }
  0x93   :  { %v449_v55 = vmul.f32 0.5, %v448_v49  ;;  %v306_v56 = vmul.f32 0.0078125, %v187_v53  ;;  %v305_v60 = vmul.f32 0.0078125, %v185_v54  ;;  %v183_v61 = vpop.xlane.xlu0 %182 }
  0x94   :  { %v470_v3 = vsub.f32 1.5, %v469_v51  ;;  %v429_v4 = vmul.f32 0.5, %v428_v52 }
  0x95   :  { %v1693_v5 = vpop.eup %1294  ;;  %v450_v9 = vsub.f32 1.5, %v449_v55  ;;  %v1697_v10 = vadd.f32 1e-06, %v306_v56  ;;  %v1718_v41 = vadd.f32 1e-06, %v305_v60 }
  0x96   :  { %v1699_v11 = vpop.eup %1296  ;;  %v471_v15 = vmul.f32 %v1655_v28, %v470_v3  ;;  %v430_v16 = vsub.f32 1.5, %v429_v4  ;;  %v477_v17 = vmul.f32 %v1693_v5, %v1657_v29  ;;  %vm483_vm12 = vweird.f32 %v1693_v5 }
  0x97   :  { %v1706_v22 = vpop.eup %1298  ;;  %v451_v27 = vmul.f32 %v1661_v35, %v450_v9  ;;  %v457_v37 = vmul.f32 %v1699_v11, %v1659_v33  ;;  %1300 = vrsqrt.f32 %v1697_v10  ;;  %276 = vadd.xlane.f32.xlu2 %v159_v34  ;;  %274 = vadd.xlane.f32.xlu1 %v158_v39  ;;  %vm463_vm13 = vweird.f32 %v1699_v11  ;;  %vm484_vm15 = vmor %vm482_vm5, %vm483_vm12 }
  0x98   :  { %v475_v43 = vsel %vm474_vm8, %v1655_v28, %v471_v15  ;;  %v431_v57 = vmul.f32 %v1667_v42, %v430_v16  ;;  %v478_v46 = vmul.f32 %v1693_v5, %v477_v17  ;;  %v437_v47 = vmul.f32 %v1706_v22, %v1665_v38  ;;  %272 = vadd.xlane.f32.xlu0 %v157_v40  ;;  %vm464_vm0 = vmor %vm462_vm7, %vm463_vm13 }
  0x99   :  { %v1070_v34 = vmul.f32 %v475_v43, %v1570_v0  ;;  %v455_v39 = vsel %vm454_vm9, %v1661_v35, %v451_v27  ;;  %v458_v58 = vmul.f32 %v1699_v11, %v457_v37  ;;  %v304_v28 = vmul.f32 0.0078125, %v183_v61 }
  0x9a   :  { %v1068_v48 = vmul.f32 %v455_v39, %v1572_v1  ;;  %v435_v49 = vsel %vm434_vm11, %v1667_v42, %v431_v57  ;;  %v479_v51 = vmul.f32 0.5, %v478_v46  ;;  %v438_v52 = vmul.f32 %v1706_v22, %v437_v47  ;;  %v193_v40 = vpop.xlane.xlu2 %192  ;;  %v191_v53 = vpop.xlane.xlu1 %190  ;;  %v99_v1 = vld [vmem:[#allocation2 + $0x1c8] sm:$0xff] }
  0x9b   :  { %v1138_v0 = vmul.f32 %v1708_v23, %v1070_v34  ;;  %v1066_v35 = vmul.f32 %v435_v49, %v1574_v2  ;;  %v459_v59 = vmul.f32 0.5, %v458_v58  ;;  %v189_v54 = vpop.xlane.xlu0 %188  ;;  %1302 = vrsqrt.f32 %v1718_v41 }
  0x9c   :  { %v1136_v55 = vmul.f32 %v1708_v23, %v1068_v48  ;;  %v480_v56 = vsub.f32 1.5, %v479_v51  ;;  %v439_v60 = vmul.f32 0.5, %v438_v52  ;;  %v1749_v2 = vadd.f32 1e-06, %v304_v28 }
  0x9d   :  { %v1745_v42 = vpop.eup %1300  ;;  %1202 = vst [vmem:[#allocation7 + $0x20] sm:$0xff] %v1138_v0  ;;  %v1134_v61 = vmul.f32 %v1708_v23, %v1066_v35  ;;  %v460_v63 = vsub.f32 1.5, %v459_v59  ;;  %vm443_vm14 = vweird.f32 %v1706_v22  ;;  %v309_v16 = vmul.f32 0.0078125, %v193_v40 }
  0x9e   :  { %1200 = vst [vmem:[#allocation7 + $0x10] sm:$0xff] %v1136_v55  ;;  %v481_v3 = vmul.f32 %v1693_v5, %v480_v56  ;;  %v440_v4 = vsub.f32 1.5, %v439_v60  ;;  %v507_v9 = vmul.f32 %v1745_v42, %v1697_v10  ;;  %1304 = vrsqrt.f32 %v1749_v2  ;;  %vm444_vm1 = vmor %vm442_vm10, %vm443_vm14 }
  0x9f   :  { %1198 = vst [vmem:[#allocation7] sm:$0xff] %v1134_v61  ;;  %v461_v15 = vmul.f32 %v1699_v11, %v460_v63  ;;  %282 = vadd.xlane.f32.xlu2 %v1672_v44  ;;  %280 = vadd.xlane.f32.xlu1 %v1674_v45  ;;  %v163_v17 = vmul.f32 %v99_v1, %v99_v1  ;;  %v308_v43 = vmul.f32 0.0078125, %v191_v53  ;;  %v1777_v45 = vadd.f32 1e-06, %v309_v16 }
  0xa0   :  { %v485_v27 = vsel %vm484_vm15, %v1693_v5, %v481_v3  ;;  %v441_v29 = vmul.f32 %v1706_v22, %v440_v4  ;;  %v508_v37 = vmul.f32 %v1745_v42, %v507_v9  ;;  %278 = vadd.xlane.f32.xlu0 %v1684_v50  ;;  %v307_v33 = vmul.f32 0.0078125, %v189_v54  ;;  %v104_v54 = vld [vmem:[#allocation2 + $0x1f0] sm:$0xff] }
  0xa1   :  { %v1071_v57 = vmul.f32 %v485_v27, %v1582_v6  ;;  %v465_v44 = vsel %vm464_vm0, %v1699_v11, %v461_v15  ;;  %v1779_v5 = vpop.eup %1302  ;;  %v1783_v50 = vadd.f32 1e-06, %v308_v43  ;;  %vm512_vm2 = vweird.f32 %v1697_v10  ;;  %v103_v10 = vld [vmem:[#allocation2 + $0x1e8] sm:$0xff] }
  0xa2   :  { %v1069_v46 = vmul.f32 %v465_v44, %v1584_v7  ;;  %v445_v47 = vsel %vm444_vm1, %v1706_v22, %v441_v29  ;;  %v509_v34 = vmul.f32 0.5, %v508_v37  ;;  %v199_v6 = vpop.xlane.xlu2 %198  ;;  %v197_v39 = vpop.xlane.xlu1 %196  ;;  %v497_v38 = vmul.f32 %v1779_v5, %v1718_v41 }
  0xa3   :  { %v1139_v11 = vmul.f32 %v1708_v23, %v1071_v57  ;;  %v1067_v58 = vmul.f32 %v445_v47, %v1586_v8  ;;  %v195_v28 = vpop.xlane.xlu0 %194  ;;  %vm513_vm3 = vweird.f32 %v1745_v42  ;;  %1306 = vrsqrt.f32 %v1777_v45 }
  0xa4   :  { %v1137_v48 = vmul.f32 %v1708_v23, %v1069_v46  ;;  %v510_v7 = vsub.f32 1.5, %v509_v34  ;;  %v1793_v22 = vpop.eup %1304  ;;  %v498_v8 = vmul.f32 %v1779_v5, %v497_v38  ;;  %1308 = vrsqrt.f32 %v1783_v50  ;;  %vm514_vm5 = vmor %vm512_vm2, %vm513_vm3 }
  0xa5   :  { %1203 = vst [vmem:[#allocation7 + $0x28] sm:$0xff] %v1139_v11  ;;  %v1135_v49 = vmul.f32 %v1708_v23, %v1067_v58  ;;  %vm502_vm4 = vweird.f32 %v1718_v41  ;;  %v487_v52 = vmul.f32 %v1793_v22, %v1749_v2  ;;  %v1802_v40 = vadd.f32 1e-06, %v307_v33 }
  0xa6   :  { %1201 = vst [vmem:[#allocation7 + $0x18] sm:$0xff] %v1137_v48  ;;  %v511_v51 = vmul.f32 %v1745_v42, %v510_v7  ;;  %v499_v53 = vmul.f32 0.5, %v498_v8  ;;  %v312_v0 = vmul.f32 0.0078125, %v199_v6  ;;  %v311_v35 = vmul.f32 0.0078125, %v197_v39 }
  0xa7   :  { %1199 = vst [vmem:[#allocation7 + $0x8] sm:$0xff] %v1135_v49  ;;  %v310_v59 = vmul.f32 0.0078125, %v195_v28  ;;  %288 = vadd.xlane.f32.xlu2 %v1689_v62  ;;  %286 = vadd.xlane.f32.xlu1 %v1704_v21  ;;  %vm503_vm6 = vweird.f32 %v1779_v5  ;;  %v488_v56 = vmul.f32 %v1793_v22, %v487_v52  ;;  %1310 = vrsqrt.f32 %v1802_v40 }
  0xa8   :  { %v515_v55 = vsel %vm514_vm5, %v1745_v42, %v511_v51  ;;  %284 = vadd.xlane.f32.xlu0 %v163_v17  ;;  %v500_v1 = vsub.f32 1.5, %v499_v53  ;;  %v1813_v61 = vadd.f32 1e-06, %v312_v0  ;;  %v1815_v63 = vadd.f32 1e-06, %v311_v35  ;;  %vm504_vm8 = vmor %vm502_vm4, %vm503_vm6 }
  0xa9   :  { %v1074_v60 = vmul.f32 %v515_v55, %v1594_v12  ;;  %v1817_v62 = vpop.eup %1306  ;;  %v489_v21 = vmul.f32 0.5, %v488_v56  ;;  %vm492_vm7 = vweird.f32 %v1749_v2  ;;  %v1820_v42 = vadd.f32 1e-06, %v310_v59 }
  0xaa   :  { %v205_v3 = vpop.xlane.xlu2 %204  ;;  %v203_v4 = vpop.xlane.xlu1 %202  ;;  %v168_v9 = vmul.f32 %v104_v54, %v104_v54  ;;  %v501_v12 = vmul.f32 %v1779_v5, %v500_v1  ;;  %v537_v17 = vmul.f32 %v1817_v62, %v1777_v45  ;;  %v167_v29 = vmul.f32 %v103_v10, %v103_v10 }
  0xab   :  { %v1822_v15 = vpop.eup %1308  ;;  %v1142_v16 = vmul.f32 %v1708_v23, %v1074_v60  ;;  %v201_v27 = vpop.xlane.xlu0 %200  ;;  %v490_v37 = vsub.f32 1.5, %v489_v21  ;;  %vm493_vm9 = vweird.f32 %v1793_v22  ;;  %1312 = vrsqrt.f32 %v1813_v61 }
  0xac   :  { %v527_v43 = vmul.f32 %v1822_v15, %v1783_v50  ;;  %v505_v57 = vsel %vm504_vm8, %v1779_v5, %v501_v12  ;;  %v538_v44 = vmul.f32 %v1817_v62, %v537_v17  ;;  %vm542_vm10 = vweird.f32 %v1777_v45  ;;  %vm494_vm12 = vmor %vm492_vm7, %vm493_vm9 }
  0xad   :  { %1206 = vst [vmem:[#allocation7 + $0x40] sm:$0xff] %v1142_v16  ;;  %1314 = vrsqrt.f32 %v1815_v63  ;;  %v1840_v33 = vpop.eup %1310  ;;  %v1073_v41 = vmul.f32 %v505_v57, %v1596_v13  ;;  %v491_v46 = vmul.f32 %v1793_v22, %v490_v37  ;;  %vm532_vm11 = vweird.f32 %v1783_v50  ;;  %v102_v13 = vld [vmem:[#allocation2 + $0x1e0] sm:$0xff] }
  0xae   :  { %v528_v47 = vmul.f32 %v1822_v15, %v527_v43  ;;  %v539_v5 = vmul.f32 0.5, %v538_v44  ;;  %vm543_vm13 = vweird.f32 %v1817_v62  ;;  %v517_v34 = vmul.f32 %v1840_v33, %v1802_v40 }
  0xaf   :  { %vm522_vm14 = vweird.f32 %v1802_v40  ;;  %1316 = vrsqrt.f32 %v1820_v42  ;;  %294 = vadd.xlane.f32.xlu2 %v168_v9  ;;  %292 = vadd.xlane.f32.xlu1 %v167_v29  ;;  %v1141_v6 = vmul.f32 %v1708_v23, %v1073_v41  ;;  %v495_v39 = vsel %vm494_vm12, %v1793_v22, %v491_v46  ;;  %vm544_vm3 = vmor %vm542_vm10, %vm543_vm13 }
  0xb0   :  { %v529_v11 = vmul.f32 0.5, %v528_v47  ;;  %vm533_vm15 = vweird.f32 %v1822_v15  ;;  %v1072_v2 = vmul.f32 %v495_v39, %v1598_v14  ;;  %v540_v58 = vsub.f32 1.5, %v539_v5 }
  0xb1   :  { %v518_v38 = vmul.f32 %v1840_v33, %v517_v34  ;;  %vm572_vm0 = vweird.f32 %v1813_v61  ;;  %v315_v28 = vmul.f32 0.0078125, %v205_v3  ;;  %v1859_v48 = vpop.eup %1312  ;;  %1205 = vst [vmem:[#allocation7 + $0x38] sm:$0xff] %v1141_v6  ;;  %vm523_vm1 = vweird.f32 %v1840_v33  ;;  %vm534_vm5 = vmor %vm532_vm11, %vm533_vm15 }
  0xb2   :  { %v530_v7 = vsub.f32 1.5, %v529_v11  ;;  %vm562_vm2 = vweird.f32 %v1815_v63  ;;  %v314_v22 = vmul.f32 0.0078125, %v203_v4  ;;  %v166_v49 = vmul.f32 %v102_v13, %v102_v13  ;;  %v211_v8 = vpop.xlane.xlu2 %210  ;;  %v209_v51 = vpop.xlane.xlu1 %208  ;;  %vm524_vm7 = vmor %vm522_vm14, %vm523_vm1 }
  0xb3   :  { %v1863_v52 = vpop.eup %1314  ;;  %v1140_v14 = vmul.f32 %v1708_v23, %v1072_v2  ;;  %v541_v53 = vmul.f32 %v1817_v62, %v540_v58  ;;  %v519_v0 = vmul.f32 0.5, %v518_v38  ;;  %v567_v35 = vmul.f32 %v1859_v48, %v1813_v61  ;;  %v1869_v59 = vpop.xlane.xlu0 %206 }
  0xb4   :  { %v531_v54 = vmul.f32 %v1822_v15, %v530_v7  ;;  %vm573_vm4 = vweird.f32 %v1859_v48  ;;  %v557_v55 = vmul.f32 %v1863_v52, %v1815_v63  ;;  %v313_v56 = vmul.f32 0.0078125, %v201_v27  ;;  %290 = vadd.xlane.f32.xlu0 %v166_v49 }
  0xb5   :  { %v1317_v10 = vpop.eup %1316  ;;  %1204 = vst [vmem:[#allocation7 + $0x30] sm:$0xff] %v1140_v14  ;;  %v545_v60 = vsel %vm544_vm3, %v1817_v62, %v541_v53  ;;  %v520_v45 = vsub.f32 1.5, %v519_v0  ;;  %v568_v1 = vmul.f32 %v1859_v48, %v567_v35  ;;  %v1885_v21 = vadd.f32 1e-06, %v315_v28  ;;  %vm574_vm9 = vmor %vm572_vm0, %vm573_vm4 }
  0xb6   :  { %v1077_v3 = vmul.f32 %v545_v60, %v1606_v18  ;;  %v535_v4 = vsel %vm534_vm5, %v1822_v15, %v531_v54  ;;  %v558_v9 = vmul.f32 %v1863_v52, %v557_v55  ;;  %v547_v16 = vmul.f32 %v1317_v10, %v1820_v42 }
  0xb7   :  { %v1076_v62 = vmul.f32 %v535_v4, %v1608_v19  ;;  %v521_v12 = vmul.f32 %v1840_v33, %v520_v45  ;;  %v569_v17 = vmul.f32 0.5, %v568_v1  ;;  %vm563_vm6 = vweird.f32 %v1863_v52 }
  0xb8   :  { %v1145_v50 = vmul.f32 %v1708_v23, %v1077_v3  ;;  %v559_v18 = vmul.f32 0.5, %v558_v9  ;;  %v548_v15 = vmul.f32 %v1317_v10, %v547_v16  ;;  %1318 = vrsqrt.f32 %v1885_v21  ;;  %vm564_vm10 = vmor %vm562_vm2, %vm563_vm6 }
  0xb9   :  { %v1144_v27 = vmul.f32 %v1708_v23, %v1076_v62  ;;  %v525_v19 = vsel %vm524_vm7, %v1840_v33, %v521_v12  ;;  %v570_v29 = vsub.f32 1.5, %v569_v17  ;;  %vm553_vm8 = vweird.f32 %v1317_v10 }
  0xba   :  { %1209 = vst [vmem:[#allocation7 + $0x58] sm:$0xff] %v1145_v50  ;;  %v1075_v37 = vmul.f32 %v525_v19, %v1610_v20  ;;  %v560_v43 = vsub.f32 1.5, %v559_v18  ;;  %v549_v57 = vmul.f32 0.5, %v548_v15  ;;  %v1903_v44 = vadd.f32 1e-06, %v314_v22  ;;  %v217_v41 = vpop.xlane.xlu2 %216  ;;  %v215_v40 = vpop.xlane.xlu1 %214 }
  0xbb   :  { %1208 = vst [vmem:[#allocation7 + $0x50] sm:$0xff] %v1144_v27  ;;  %v571_v46 = vmul.f32 %v1859_v48, %v570_v29  ;;  %v1906_v47 = vadd.f32 1e-06, %v313_v56  ;;  %v318_v5 = vmul.f32 0.0078125, %v211_v8  ;;  %v317_v34 = vmul.f32 0.0078125, %v209_v51  ;;  %v213_v13 = vpop.xlane.xlu0 %212 }
  0xbc   :  { %v1143_v33 = vmul.f32 %v1708_v23, %v1075_v37  ;;  %v561_v20 = vmul.f32 %v1863_v52, %v560_v43  ;;  %v550_v6 = vsub.f32 1.5, %v549_v57  ;;  %1320 = vrsqrt.f32 %v1903_v44 }
  0xbd   :  { %v575_v39 = vsel %vm574_vm9, %v1859_v48, %v571_v46  ;;  %vm552_vm11 = vweird.f32 %v1820_v42  ;;  %1322 = vrsqrt.f32 %v1906_v47  ;;  %v1926_v38 = vadd.f32 1e-06, %v318_v5  ;;  %v105_v48 = vld [vmem:[#allocation2 + $0x1f8] sm:$0xff] }
  0xbe   :  { %v1922_v11 = vpop.eup %1318  ;;  %1207 = vst [vmem:[#allocation7 + $0x48] sm:$0xff] %v1143_v33  ;;  %v1080_v61 = vmul.f32 %v575_v39, %v1618_v24  ;;  %v565_v2 = vsel %vm564_vm10, %v1863_v52, %v561_v20  ;;  %v551_v58 = vmul.f32 %v1317_v10, %v550_v6  ;;  %vm554_vm12 = vmor %vm552_vm11, %vm553_vm8  ;;  %v1932_v42 = vadd.f32 1e-06, %v317_v34 }
  0xbf   :  { %v1079_v28 = vmul.f32 %v565_v2, %v1620_v25  ;;  %v597_v63 = vmul.f32 %v1922_v11, %v1885_v21  ;;  %1324 = vrsqrt.f32 %v1926_v38  ;;  %vm602_vm13 = vweird.f32 %v1885_v21 }
  0xc0   :  { %v1148_v7 = vmul.f32 %v1708_v23, %v1080_v61  ;;  %v555_v22 = vsel %vm554_vm12, %v1317_v10, %v551_v58  ;;  %1326 = vrsqrt.f32 %v1932_v42  ;;  %v316_v51 = vmul.f32 0.0078125, %v1869_v59 }
  0xc1   :  { %v1147_v24 = vmul.f32 %v1708_v23, %v1079_v28  ;;  %v1078_v49 = vmul.f32 %v555_v22, %v1622_v26  ;;  %v598_v8 = vmul.f32 %v1922_v11, %v597_v63  ;;  %v169_v52 = vmul.f32 %v105_v48, %v105_v48 }
  0xc2   :  { %v1940_v25 = vpop.eup %1320  ;;  %1212 = vst [vmem:[#allocation7 + $0x70] sm:$0xff] %v1148_v7  ;;  %v321_v14 = vmul.f32 0.0078125, %v217_v41  ;;  %v1944_v53 = vpop.xlane.xlu2 %222  ;;  %vm592_vm14 = vweird.f32 %v1903_v44  ;;  %vm582_vm15 = vweird.f32 %v1906_v47  ;;  %v1959_v10 = vadd.f32 1e-06, %v316_v51 }
  0xc3   :  { %v1946_v0 = vpop.xlane.xlu1 %220  ;;  %v1948_v35 = vpop.eup %1322  ;;  %1211 = vst [vmem:[#allocation7 + $0x68] sm:$0xff] %v1147_v24  ;;  %v1146_v26 = vmul.f32 %v1708_v23, %v1078_v49  ;;  %v599_v54 = vmul.f32 0.5, %v598_v8  ;;  %v587_v55 = vmul.f32 %v1940_v25, %v1903_v44  ;;  %296 = vadd.xlane.f32.xlu0 %v169_v52  ;;  %vm603_vm0 = vweird.f32 %v1922_v11 }
  0xc4   :  { %v1954_v56 = vpop.xlane.xlu0 %218  ;;  %v577_v59 = vmul.f32 %v1948_v35, %v1906_v47  ;;  %v1961_v60 = vadd.f32 1e-06, %v321_v14  ;;  %v320_v3 = vmul.f32 0.0078125, %v215_v40  ;;  %vm632_vm1 = vweird.f32 %v1926_v38  ;;  %vm604_vm3 = vmor %vm602_vm13, %vm603_vm0 }
  0xc5   :  { %1210 = vst [vmem:[#allocation7 + $0x60] sm:$0xff] %v1146_v26  ;;  %v600_v45 = vsub.f32 1.5, %v599_v54  ;;  %v588_v1 = vmul.f32 %v1940_v25, %v587_v55  ;;  %v1965_v4 = vpop.eup %1324  ;;  %1328 = vrsqrt.f32 %v1959_v10  ;;  %v319_v16 = vmul.f32 0.0078125, %v213_v13 }
  0xc6   :  { %v578_v9 = vmul.f32 %v1948_v35, %v577_v59  ;;  %v1970_v62 = vpop.eup %1326  ;;  %vm593_vm2 = vweird.f32 %v1940_v25  ;;  %v627_v50 = vmul.f32 %v1965_v4, %v1926_v38  ;;  %vm583_vm4 = vweird.f32 %v1948_v35 }
  0xc7   :  { %v601_v12 = vmul.f32 %v1922_v11, %v600_v45  ;;  %v589_v17 = vmul.f32 0.5, %v588_v1  ;;  %v617_v15 = vmul.f32 %v1970_v62, %v1932_v42  ;;  %1330 = vrsqrt.f32 %v1961_v60  ;;  %vm594_vm6 = vmor %vm592_vm14, %vm593_vm2 }
  0xc8   :  { %v579_v18 = vmul.f32 0.5, %v578_v9  ;;  %v628_v29 = vmul.f32 %v1965_v4, %v627_v50  ;;  %v1984_v37 = vadd.f32 1e-06, %v320_v3  ;;  %v1988_v41 = vadd.f32 1e-06, %v319_v16  ;;  %vm584_vm7 = vmor %vm582_vm15, %vm583_vm4 }
  0xc9   :  { %v605_v27 = vsel %vm604_vm3, %v1922_v11, %v601_v12  ;;  %v590_v19 = vsub.f32 1.5, %v589_v17  ;;  %v618_v21 = vmul.f32 %v1970_v62, %v617_v15  ;;  %vm622_vm5 = vweird.f32 %v1932_v42  ;;  %v1416_v42 = vld [vmem:[#allocation2 + $0x98] sm:$0xff] }
  0xca   :  { %v1083_v43 = vmul.f32 %v605_v27, %v1630_v30  ;;  %v580_v57 = vsub.f32 1.5, %v579_v18  ;;  %v1990_v40 = vpop.xlane.xlu2 %228  ;;  %v629_v34 = vmul.f32 0.5, %v628_v29  ;;  %1332 = vrsqrt.f32 %v1984_v37  ;;  %v1417_v29 = vld [vmem:[#allocation2 + $0x90] sm:$0xff] }
  0xcb   :  { %v1992_v46 = vpop.xlane.xlu1 %226  ;;  %v591_v5 = vmul.f32 %v1940_v25, %v590_v19  ;;  %v1997_v13 = vpop.eup %1328  ;;  %v619_v20 = vmul.f32 0.5, %v618_v21  ;;  %1334 = vrsqrt.f32 %v1988_v41  ;;  %vm633_vm8 = vweird.f32 %v1965_v4 }
  0xcc   :  { %v1151_v30 = vmul.f32 %v1708_v23, %v1083_v43  ;;  %v581_v33 = vmul.f32 %v1948_v35, %v580_v57  ;;  %v2006_v6 = vpop.xlane.xlu0 %224  ;;  %v630_v11 = vsub.f32 1.5, %v629_v34  ;;  %v607_v44 = vmul.f32 %v1997_v13, %v1959_v10  ;;  %vm634_vm12 = vmor %vm632_vm1, %vm633_vm8 }
  0xcd   :  { %v595_v39 = vsel %vm594_vm6, %v1940_v25, %v591_v5  ;;  %vm612_vm9 = vweird.f32 %v1959_v10  ;;  %vm662_vm10 = vweird.f32 %v1961_v60  ;;  %v2018_v61 = vpop.eup %1330  ;;  %v620_v28 = vsub.f32 1.5, %v619_v20 }
  0xce   :  { %1215 = vst [vmem:[#allocation7 + $0x88] sm:$0xff] %v1151_v30  ;;  %v1082_v2 = vmul.f32 %v595_v39, %v1632_v31  ;;  %v585_v58 = vsel %vm584_vm7, %v1948_v35, %v581_v33  ;;  %vm623_vm11 = vweird.f32 %v1970_v62  ;;  %v631_v63 = vmul.f32 %v1965_v4, %v630_v11  ;;  %v1418_v30 = vld [vmem:[#allocation2 + $0xb8] sm:$0xff] }
  0xcf   :  { %v1081_v47 = vmul.f32 %v585_v58, %v1634_v32  ;;  %v608_v48 = vmul.f32 %v1997_v13, %v607_v44  ;;  %v657_v7 = vmul.f32 %v2018_v61, %v1961_v60  ;;  %v621_v31 = vmul.f32 %v1970_v62, %v620_v28  ;;  %vm624_vm15 = vmor %vm622_vm5, %vm623_vm11 }
  0xd0   :  { %v1150_v22 = vmul.f32 %v1708_v23, %v1082_v2  ;;  %vm613_vm13 = vweird.f32 %v1997_v13  ;;  %vm652_vm14 = vweird.f32 %v1984_v37  ;;  %v324_v32 = vmul.f32 0.0078125, %v1944_v53  ;;  %v2037_v24 = vpop.eup %1332 }
  0xd1   :  { %v1149_v49 = vmul.f32 %v1708_v23, %v1081_v47  ;;  %v635_v8 = vsel %vm634_vm12, %v1965_v4, %v631_v63  ;;  %v609_v25 = vmul.f32 0.5, %v608_v48  ;;  %v658_v38 = vmul.f32 %v2018_v61, %v657_v7  ;;  %v2044_v51 = vpop.eup %1334  ;;  %vm614_vm2 = vmor %vm612_vm9, %vm613_vm13  ;;  %v1420_v47 = vld [vmem:[#allocation2 + $0xa8] sm:$0xff] }
  0xd2   :  { %1214 = vst [vmem:[#allocation7 + $0x80] sm:$0xff] %v1150_v22  ;;  %v1086_v52 = vmul.f32 %v635_v8, %v1642_v36  ;;  %v625_v14 = vsel %vm624_vm15, %v1970_v62, %v621_v31  ;;  %vm663_vm0 = vweird.f32 %v2018_v61  ;;  %v647_v53 = vmul.f32 %v2037_v24, %v1984_v37  ;;  %v2051_v35 = vpop.xlane.xlu2 %234 }
  0xd3   :  { %1213 = vst [vmem:[#allocation7 + $0x78] sm:$0xff] %v1149_v49  ;;  %v1085_v26 = vmul.f32 %v1416_v42, %v625_v14  ;;  %v610_v54 = vsub.f32 1.5, %v609_v25  ;;  %v659_v55 = vmul.f32 0.5, %v658_v38  ;;  %v637_v59 = vmul.f32 %v2044_v51, %v1988_v41  ;;  %v2055_v45 = vpop.xlane.xlu1 %232  ;;  %vm664_vm4 = vmor %vm662_vm10, %vm663_vm0 }
  0xd4   :  { %v1154_v36 = vmul.f32 %v1708_v23, %v1086_v52  ;;  %v648_v1 = vmul.f32 %v2037_v24, %v647_v53  ;;  %vm653_vm1 = vweird.f32 %v2037_v24  ;;  %v2060_v3 = vadd.f32 1e-06, %v324_v32  ;;  %v2072_v50 = vpop.xlane.xlu0 %230 }
  0xd5   :  { %v1153_v4 = vmul.f32 %v1708_v23, %v1085_v26  ;;  %v611_v9 = vmul.f32 %v1997_v13, %v610_v54  ;;  %v660_v16 = vsub.f32 1.5, %v659_v55  ;;  %v638_v62 = vmul.f32 %v2044_v51, %v637_v59  ;;  %vm654_vm5 = vmor %vm652_vm14, %vm653_vm1 }
  0xd6   :  { %1218 = vst [vmem:[#allocation7 + $0xa0] sm:$0xff] %v1154_v36  ;;  %v649_v12 = vmul.f32 0.5, %v648_v1  ;;  %vm643_vm3 = vweird.f32 %v2044_v51  ;;  %1336 = vrsqrt.f32 %v2060_v3  ;;  %v323_v17 = vmul.f32 0.0078125, %v1946_v0 }
  0xd7   :  { %1217 = vst [vmem:[#allocation7 + $0x98] sm:$0xff] %v1153_v4  ;;  %v615_v18 = vsel %vm614_vm2, %v1997_v13, %v611_v9  ;;  %v661_v15 = vmul.f32 %v2018_v61, %v660_v16  ;;  %v639_v27 = vmul.f32 0.5, %v638_v62  ;;  %v322_v19 = vmul.f32 0.0078125, %v1954_v56 }
  0xd8   :  { %v1084_v10 = vmul.f32 %v1417_v29, %v615_v18  ;;  %v650_v43 = vsub.f32 1.5, %v649_v12  ;;  %v2081_v57 = vadd.f32 1e-06, %v323_v17  ;;  %v327_v0 = vmul.f32 0.0078125, %v1990_v40 }
  0xd9   :  { %v665_v21 = vsel %vm664_vm4, %v2018_v61, %v661_v15  ;;  %v640_v5 = vsub.f32 1.5, %v639_v27  ;;  %v2085_v34 = vadd.f32 1e-06, %v322_v19  ;;  %v326_v13 = vmul.f32 0.0078125, %v1992_v46  ;;  %v1419_v61 = vld [vmem:[#allocation2 + $0xb0] sm:$0xff] }
  0xda   :  { %v1152_v56 = vmul.f32 %v1708_v23, %v1084_v10  ;;  %v1089_v33 = vmul.f32 %v1418_v30, %v665_v21  ;;  %v651_v20 = vmul.f32 %v2037_v24, %v650_v43  ;;  %1338 = vrsqrt.f32 %v2081_v57  ;;  %v2091_v60 = vpop.xlane.xlu2 %240  ;;  %v1421_v15 = vld [vmem:[#allocation2 + $0xd0] sm:$0xff] }
  0xdb   :  { %v641_v40 = vmul.f32 %v2044_v51, %v640_v5  ;;  %vm642_vm6 = vweird.f32 %v1988_v41  ;;  %1340 = vrsqrt.f32 %v2085_v34  ;;  %v2106_v44 = vadd.f32 1e-06, %v327_v0  ;;  %v2113_v28 = vpop.xlane.xlu1 %238 }
  0xdc   :  { %v2100_v46 = vpop.eup %1336  ;;  %1216 = vst [vmem:[#allocation7 + $0x90] sm:$0xff] %v1152_v56  ;;  %v1157_v39 = vmul.f32 %v1708_v23, %v1089_v33  ;;  %v655_v11 = vsel %vm654_vm5, %v2037_v24, %v651_v20  ;;  %vm644_vm7 = vmor %vm642_vm6, %vm643_vm3  ;;  %v2108_v37 = vadd.f32 1e-06, %v326_v13  ;;  %v325_v22 = vmul.f32 0.0078125, %v2006_v6  ;;  %v2126_v8 = vpop.xlane.xlu0 %236 }
  0xdd   :  { %v1088_v2 = vmul.f32 %v1419_v61, %v655_v11  ;;  %v645_v41 = vsel %vm644_vm7, %v2044_v51, %v641_v40  ;;  %v687_v58 = vmul.f32 %v2100_v46, %v2060_v3  ;;  %1342 = vrsqrt.f32 %v2106_v44 }
  0xde   :  { %1221 = vst [vmem:[#allocation7 + $0xb8] sm:$0xff] %v1157_v39  ;;  %v1087_v63 = vmul.f32 %v1420_v47, %v645_v41  ;;  %1344 = vrsqrt.f32 %v2108_v37  ;;  %vm692_vm8 = vweird.f32 %v2060_v3  ;;  %v330_v24 = vmul.f32 0.0078125, %v2051_v35  ;;  %v1422_v39 = vld [vmem:[#allocation2 + $0xc8] sm:$0xff] }
  0xdf   :  { %v1156_v48 = vmul.f32 %v1708_v23, %v1088_v2  ;;  %v688_v7 = vmul.f32 %v2100_v46, %v687_v58  ;;  %v329_v49 = vmul.f32 0.0078125, %v2055_v45  ;;  %vm682_vm9 = vweird.f32 %v2081_v57 }
  0xe0   :  { %v2120_v31 = vpop.eup %1338  ;;  %v1155_v32 = vmul.f32 %v1708_v23, %v1087_v63  ;;  %v2133_v6 = vadd.f32 1e-06, %v325_v22  ;;  %vm693_vm10 = vweird.f32 %v2100_v46  ;;  %v2138_v14 = vadd.f32 1e-06, %v330_v24 }
  0xe1   :  { %v2128_v25 = vpop.eup %1340  ;;  %1220 = vst [vmem:[#allocation7 + $0xb0] sm:$0xff] %v1156_v48  ;;  %v689_v38 = vmul.f32 0.5, %v688_v7  ;;  %v677_v51 = vmul.f32 %v2120_v31, %v2081_v57  ;;  %v2140_v53 = vadd.f32 1e-06, %v329_v49  ;;  %v328_v54 = vmul.f32 0.0078125, %v2072_v50  ;;  %vm694_vm14 = vmor %vm692_vm8, %vm693_vm10 }
  0xe2   :  { %1219 = vst [vmem:[#allocation7 + $0xa8] sm:$0xff] %v1155_v32  ;;  %v667_v52 = vmul.f32 %v2128_v25, %v2085_v34  ;;  %v2142_v35 = vpop.xlane.xlu2 %246  ;;  %1346 = vrsqrt.f32 %v2133_v6  ;;  %vm672_vm11 = vweird.f32 %v2085_v34  ;;  %vm722_vm12 = vweird.f32 %v2106_v44  ;;  %v1423_v34 = vld [vmem:[#allocation2 + $0xc0] sm:$0xff] }
  0xe3   :  { %v690_v42 = vsub.f32 1.5, %v689_v38  ;;  %v678_v26 = vmul.f32 %v2120_v31, %v677_v51  ;;  %v2147_v55 = vpop.eup %1342  ;;  %1348 = vrsqrt.f32 %v2138_v14  ;;  %vm712_vm13 = vweird.f32 %v2108_v37  ;;  %v2171_v18 = vpop.xlane.xlu1 %244 }
  0xe4   :  { %v668_v59 = vmul.f32 %v2128_v25, %v667_v52  ;;  %v2153_v45 = vpop.eup %1344  ;;  %v717_v4 = vmul.f32 %v2147_v55, %v2106_v44  ;;  %vm683_vm15 = vweird.f32 %v2120_v31  ;;  %1350 = vrsqrt.f32 %v2140_v53  ;;  %v2192_v30 = vpop.xlane.xlu0 %242  ;;  %v1424_v44 = vld [vmem:[#allocation2 + $0xe8] sm:$0xff] }
  0xe5   :  { %v691_v36 = vmul.f32 %v2100_v46, %v690_v42  ;;  %v679_v1 = vmul.f32 0.5, %v678_v26  ;;  %v707_v16 = vmul.f32 %v2153_v45, %v2108_v37  ;;  %v2169_v50 = vadd.f32 1e-06, %v328_v54  ;;  %vm684_vm3 = vmor %vm682_vm9, %vm683_vm15  ;;  %v1425_v26 = vld [vmem:[#allocation2 + $0xe0] sm:$0xff] }
  0xe6   :  { %v669_v9 = vmul.f32 0.5, %v668_v59  ;;  %v718_v17 = vmul.f32 %v2147_v55, %v717_v4  ;;  %vm673_vm0 = vweird.f32 %v2128_v25  ;;  %vm723_vm1 = vweird.f32 %v2147_v55 }
  0xe7   :  { %v695_v62 = vsel %vm694_vm14, %v2100_v46, %v691_v36  ;;  %v680_v12 = vsub.f32 1.5, %v679_v1  ;;  %v708_v19 = vmul.f32 %v2153_v45, %v707_v16  ;;  %vm752_vm2 = vweird.f32 %v2138_v14  ;;  %vm674_vm5 = vmor %vm672_vm11, %vm673_vm0 }
  0xe8   :  { %v1092_v3 = vmul.f32 %v1421_v15, %v695_v62  ;;  %v670_v27 = vsub.f32 1.5, %v669_v9  ;;  %v2175_v29 = vpop.eup %1346  ;;  %v719_v43 = vmul.f32 0.5, %v718_v17  ;;  %1352 = vrsqrt.f32 %v2169_v50  ;;  %vm724_vm8 = vmor %vm722_vm12, %vm723_vm1  ;;  %v1426_v15 = vld [vmem:[#allocation2 + $0xd8] sm:$0xff] }
  0xe9   :  { %v681_v10 = vmul.f32 %v2120_v31, %v680_v12  ;;  %v2181_v0 = vpop.eup %1348  ;;  %v709_v13 = vmul.f32 0.5, %v708_v19  ;;  %v697_v56 = vmul.f32 %v2175_v29, %v2133_v6  ;;  %vm702_vm4 = vweird.f32 %v2133_v6 }
  0xea   :  { %v1160_v21 = vmul.f32 %v1708_v23, %v1092_v3  ;;  %v671_v5 = vmul.f32 %v2128_v25, %v670_v27  ;;  %v720_v20 = vsub.f32 1.5, %v719_v43  ;;  %vm713_vm6 = vweird.f32 %v2153_v45  ;;  %v2202_v40 = vpop.xlane.xlu2 %252  ;;  %v2204_v46 = vpop.eup %1350 }
  0xeb   :  { %v685_v33 = vsel %vm684_vm3, %v2120_v31, %v681_v10  ;;  %v747_v57 = vmul.f32 %v2181_v0, %v2138_v14  ;;  %v710_v2 = vsub.f32 1.5, %v709_v13  ;;  %v698_v41 = vmul.f32 %v2175_v29, %v697_v56  ;;  %vm714_vm9 = vmor %vm712_vm13, %vm713_vm6  ;;  %v251_v59 = vpop.xlane.xlu1 %250  ;;  %v1427_v10 = vld [vmem:[#allocation2 + $0x100] sm:$0xff] }
  0xec   :  { %1224 = vst [vmem:[#allocation7 + $0xd0] sm:$0xff] %v1160_v21  ;;  %v1091_v11 = vmul.f32 %v1422_v39, %v685_v33  ;;  %v675_v61 = vsel %vm674_vm5, %v2128_v25, %v671_v5  ;;  %vm742_vm7 = vweird.f32 %v2140_v53  ;;  %v721_v47 = vmul.f32 %v2147_v55, %v720_v20  ;;  %v249_v6 = vpop.xlane.xlu0 %248  ;;  %v2262_v13 = vld [vmem:[#allocation5] ss:$0 sm:$0xff] }
  0xed   :  { %v1090_v58 = vmul.f32 %v1423_v34, %v675_v61  ;;  %v748_v63 = vmul.f32 %v2181_v0, %v747_v57  ;;  %v333_v48 = vmul.f32 0.0078125, %v2091_v60  ;;  %v711_v22 = vmul.f32 %v2153_v45, %v710_v2  ;;  %v1429_v57 = vld [vmem:[#allocation2 + $0xf8] sm:$0xff] }
  0xee   :  { %v1159_v7 = vmul.f32 %v1708_v23, %v1091_v11  ;;  %v699_v31 = vmul.f32 0.5, %v698_v41  ;;  %v737_v32 = vmul.f32 %v2204_v46, %v2140_v53  ;;  %v2220_v24 = vpop.eup %1352  ;;  %v725_v25 = vsel %vm724_vm8, %v2147_v55, %v721_v47 }
  0xef   :  { %v1158_v49 = vmul.f32 %v1708_v23, %v1090_v58  ;;  %vm703_vm10 = vweird.f32 %v2175_v29  ;;  %v749_v60 = vmul.f32 0.5, %v748_v63  ;;  %v1095_v38 = vmul.f32 %v1424_v44, %v725_v25 }
  0xf0   :  { %1223 = vst [vmem:[#allocation7 + $0xc8] sm:$0xff] %v1159_v7  ;;  %v715_v51 = vsel %vm714_vm9, %v2153_v45, %v711_v22  ;;  %v700_v52 = vsub.f32 1.5, %v699_v31  ;;  %v738_v42 = vmul.f32 %v2204_v46, %v737_v32  ;;  %vm753_vm11 = vweird.f32 %v2181_v0  ;;  %vm704_vm13 = vmor %vm702_vm4, %vm703_vm10 }
  0xf1   :  { %1222 = vst [vmem:[#allocation7 + $0xc0] sm:$0xff] %v1158_v49  ;;  %v1094_v54 = vmul.f32 %v1425_v26, %v715_v51  ;;  %v750_v55 = vsub.f32 1.5, %v749_v60  ;;  %v727_v37 = vmul.f32 %v2220_v24, %v2169_v50  ;;  %vm732_vm12 = vweird.f32 %v2169_v50  ;;  %vm754_vm14 = vmor %vm752_vm2, %vm753_vm11 }
  0xf2   :  { %v1163_v36 = vmul.f32 %v1708_v23, %v1095_v38  ;;  %v701_v1 = vmul.f32 %v2175_v29, %v700_v52  ;;  %v739_v45 = vmul.f32 0.5, %v738_v42  ;;  %v2237_v4 = vadd.f32 1e-06, %v333_v48 }
  0xf3   :  { %v1162_v9 = vmul.f32 %v1708_v23, %v1094_v54  ;;  %v751_v16 = vmul.f32 %v2181_v0, %v750_v55  ;;  %v728_v62 = vmul.f32 %v2220_v24, %v727_v37  ;;  %v332_v12 = vmul.f32 0.0078125, %v2113_v28 }
  0xf4   :  { %1227 = vst [vmem:[#allocation7 + $0xe8] sm:$0xff] %v1163_v36  ;;  %v705_v17 = vsel %vm704_vm13, %v2175_v29, %v701_v1  ;;  %v740_v23 = vsub.f32 1.5, %v739_v45  ;;  %vm743_vm15 = vweird.f32 %v2204_v46  ;;  %1354 = vrsqrt.f32 %v2237_v4  ;;  %v2257_v29 = vpop.xlane.xlu2 %258  ;;  %v2306_v49 = vpop.xlane.xlu0 %254 }
  0xf5   :  { %1226 = vst [vmem:[#allocation7 + $0xe0] sm:$0xff] %v1162_v9  ;;  %v1093_v3 = vmul.f32 %v1426_v15, %v705_v17  ;;  %v755_v27 = vsel %vm754_vm14, %v2181_v0, %v751_v16  ;;  %v729_v28 = vmul.f32 0.5, %v728_v62  ;;  %v2255_v19 = vadd.f32 1e-06, %v332_v12  ;;  %vm744_vm0 = vmor %vm742_vm7, %vm743_vm15  ;;  %v1431_v15 = vld [vmem:[#allocation2 + $0x118] sm:$0xff] }
  0xf6   :  { %v1098_v43 = vmul.f32 %v1427_v10, %v755_v27  ;;  %v741_v14 = vmul.f32 %v2204_v46, %v740_v23  ;;  %v331_v21 = vmul.f32 0.0078125, %v2126_v8  ;;  %v336_v5 = vmul.f32 0.0078125, %v2142_v35 }
  0xf7   :  { %v1161_v56 = vmul.f32 %v2262_v13, %v1093_v3  ;;  %v730_v0 = vsub.f32 1.5, %v729_v28  ;;  %vm733_vm1 = vweird.f32 %v2220_v24  ;;  %1356 = vrsqrt.f32 %v2255_v19 }
  0xf8   :  { %v1166_v33 = vmul.f32 %v2262_v13, %v1098_v43  ;;  %v745_v8 = vsel %vm744_vm0, %v2204_v46, %v741_v14  ;;  %v2273_v20 = vadd.f32 1e-06, %v331_v21  ;;  %v2275_v35 = vadd.f32 1e-06, %v336_v5  ;;  %vm734_vm2 = vmor %vm732_vm12, %vm733_vm1 }
  0xf9   :  { %1225 = vst [vmem:[#allocation7 + $0xd8] sm:$0xff] %v1161_v56  ;;  %v1097_v39 = vmul.f32 %v1429_v57, %v745_v8  ;;  %v731_v11 = vmul.f32 %v2220_v24, %v730_v0  ;;  %v335_v53 = vmul.f32 0.0078125, %v2171_v18  ;;  %v334_v61 = vmul.f32 0.0078125, %v2192_v30  ;;  %v2290_v18 = vpop.xlane.xlu1 %256  ;;  %v1430_v30 = vld [vmem:[#allocation2 + $0xf0] sm:$0xff] }
  0xfa   :  { %v2280_v2 = vpop.eup %1354  ;;  %1230 = vst [vmem:[#allocation7 + $0x100] sm:$0xff] %v1166_v33  ;;  %1358 = vrsqrt.f32 %v2273_v20  ;;  %v339_v46 = vmul.f32 0.0078125, %v2202_v40  ;;  %v338_v22 = vmul.f32 0.0078125, %v251_v59  ;;  %v337_v31 = vmul.f32 0.0078125, %v249_v6 }
  0xfb   :  { %v1165_v41 = vmul.f32 %v2262_v13, %v1097_v39  ;;  %v735_v34 = vsel %vm734_vm2, %v2220_v24, %v731_v11  ;;  %v777_v58 = vmul.f32 %v2280_v2, %v2237_v4  ;;  %1360 = vrsqrt.f32 %v2275_v35 }
  0xfc   :  { %v1096_v47 = vmul.f32 %v1430_v30, %v735_v34  ;;  %v2293_v63 = vadd.f32 1e-06, %v335_v53  ;;  %v2295_v50 = vadd.f32 1e-06, %v334_v61  ;;  %v2300_v7 = vadd.f32 1e-06, %v339_v46  ;;  %v2310_v60 = vpop.xlane.xlu2 %264  ;;  %v2375_v8 = vpop.xlane.xlu0 %260 }
  0xfd   :  { %v2297_v48 = vpop.eup %1356  ;;  %1229 = vst [vmem:[#allocation7 + $0xf8] sm:$0xff] %v1165_v41  ;;  %v778_v40 = vmul.f32 %v2280_v2, %v777_v58  ;;  %vm782_vm3 = vweird.f32 %v2237_v4  ;;  %vm772_vm4 = vweird.f32 %v2255_v19  ;;  %v2317_v51 = vadd.f32 1e-06, %v338_v22 }
  0xfe   :  { %v1164_v32 = vmul.f32 %v2262_v13, %v1096_v47  ;;  %v767_v24 = vmul.f32 %v2297_v48, %v2255_v19  ;;  %1362 = vrsqrt.f32 %v2293_v63  ;;  %vm783_vm5 = vweird.f32 %v2280_v2  ;;  %v1432_v19 = vld [vmem:[#allocation2 + $0x110] sm:$0xff] }
  0xff   :  { %v779_v25 = vmul.f32 0.5, %v778_v40  ;;  %1364 = vrsqrt.f32 %v2295_v50  ;;  %vm762_vm6 = vweird.f32 %v2273_v20  ;;  %vm812_vm7 = vweird.f32 %v2275_v35  ;;  %vm784_vm10 = vmor %vm782_vm3, %vm783_vm5  ;;  %v1433_v40 = vld [vmem:[#allocation2 + $0x108] sm:$0xff] }
 0x100   :  { %v2312_v44 = vpop.eup %1358  ;;  %1228 = vst [vmem:[#allocation7 + $0xf0] sm:$0xff] %v1164_v32  ;;  %v768_v38 = vmul.f32 %v2297_v48, %v767_v24  ;;  %1366 = vrsqrt.f32 %v2300_v7  ;;  %v2324_v26 = vadd.f32 1e-06, %v337_v31  ;;  %vm773_vm8 = vweird.f32 %v2297_v48 }
 0x101   :  { %v780_v52 = vsub.f32 1.5, %v779_v25  ;;  %v757_v42 = vmul.f32 %v2312_v44, %v2273_v20  ;;  %v2326_v54 = vpop.eup %1360  ;;  %1368 = vrsqrt.f32 %v2317_v51  ;;  %v342_v37 = vmul.f32 0.0078125, %v2257_v29  ;;  %v2351_v6 = vpop.xlane.xlu1 %262  ;;  %vm774_vm15 = vmor %vm772_vm4, %vm773_vm8 }
 0x102   :  { %v769_v55 = vmul.f32 0.5, %v768_v38  ;;  %v807_v1 = vmul.f32 %v2326_v54, %v2275_v35  ;;  %vm802_vm9 = vweird.f32 %v2293_v63  ;;  %vm763_vm11 = vweird.f32 %v2312_v44 }
 0x103   :  { %v781_v59 = vmul.f32 %v2280_v2, %v780_v52  ;;  %v758_v36 = vmul.f32 %v2312_v44, %v757_v42  ;;  %vm813_vm12 = vweird.f32 %v2326_v54  ;;  %1370 = vrsqrt.f32 %v2324_v26  ;;  %vm764_vm2 = vmor %vm762_vm6, %vm763_vm11  ;;  %v1434_v52 = vld [vmem:[#allocation2 + $0x130] sm:$0xff] }
 0x104   :  { %v2336_v45 = vpop.eup %1362  ;;  %v770_v9 = vsub.f32 1.5, %v769_v55  ;;  %v808_v17 = vmul.f32 %v2326_v54, %v807_v1  ;;  %vm792_vm13 = vweird.f32 %v2295_v50  ;;  %vm842_vm14 = vweird.f32 %v2300_v7  ;;  %v2379_v61 = vpop.xlane.xlu2 %270  ;;  %vm814_vm4 = vmor %vm812_vm7, %vm813_vm12  ;;  %v1435_v1 = vld [vmem:[#allocation2 + $0x128] sm:$0xff] }
 0x105   :  { %v2345_v16 = vpop.eup %1364  ;;  %v785_v62 = vsel %vm784_vm10, %v2280_v2, %v781_v59  ;;  %v759_v12 = vmul.f32 0.5, %v758_v36  ;;  %v797_v23 = vmul.f32 %v2336_v45, %v2293_v63  ;;  %v2360_v29 = vadd.f32 1e-06, %v342_v37 }
 0x106   :  { %v2353_v4 = vpop.eup %1366  ;;  %v1101_v3 = vmul.f32 %v1431_v15, %v785_v62  ;;  %v771_v27 = vmul.f32 %v2297_v48, %v770_v9  ;;  %v787_v28 = vmul.f32 %v2345_v16, %v2295_v50  ;;  %v809_v43 = vmul.f32 0.5, %v808_v17 }
 0x107   :  { %v760_v10 = vsub.f32 1.5, %v759_v12  ;;  %v798_v14 = vmul.f32 %v2336_v45, %v797_v23  ;;  %vm803_vm0 = vweird.f32 %v2336_v45  ;;  %v2368_v21 = vpop.eup %1368  ;;  %v837_v33 = vmul.f32 %v2353_v4, %v2300_v7  ;;  %v1436_v12 = vld [vmem:[#allocation2 + $0x120] sm:$0xff] }
 0x108   :  { %v1169_v5 = vmul.f32 %v2262_v13, %v1101_v3  ;;  %v775_v56 = vsel %vm774_vm15, %v2297_v48, %v771_v27  ;;  %v788_v0 = vmul.f32 %v2345_v16, %v787_v28  ;;  %v810_v11 = vsub.f32 1.5, %v809_v43  ;;  %vm804_vm6 = vmor %vm802_vm9, %vm803_vm0  ;;  %v267_v27 = vpop.xlane.xlu0 %266 }
 0x109   :  { %v1100_v57 = vmul.f32 %v1432_v19, %v775_v56  ;;  %v761_v39 = vmul.f32 %v2312_v44, %v760_v10  ;;  %v799_v53 = vmul.f32 0.5, %v798_v14  ;;  %vm832_vm1 = vweird.f32 %v2317_v51  ;;  %v2381_v2 = vpop.eup %1370  ;;  %v269_v36 = vpop.xlane.xlu1 %268  ;;  %v1437_v10 = vld [vmem:[#allocation2 + $0x148] sm:$0xff] }
 0x10a   :  { %1233 = vst [vmem:[#allocation7 + $0x118] sm:$0xff] %v1169_v5  ;;  %v789_v46 = vmul.f32 0.5, %v788_v0  ;;  %vm793_vm3 = vweird.f32 %v2345_v16  ;;  %v838_v41 = vmul.f32 %v2353_v4, %v837_v33  ;;  %v827_v34 = vmul.f32 %v2368_v21, %v2317_v51 }
 0x10b   :  { %v1168_v58 = vmul.f32 %v2262_v13, %v1100_v57  ;;  %v765_v30 = vsel %vm764_vm2, %v2312_v44, %v761_v39  ;;  %v811_v47 = vmul.f32 %v2326_v54, %v810_v11  ;;  %v800_v48 = vsub.f32 1.5, %v799_v53  ;;  %vm794_vm7 = vmor %vm792_vm13, %vm793_vm3  ;;  %v1438_v39 = vld [vmem:[#allocation2 + $0x140] sm:$0xff] }
 0x10c   :  { %v1099_v22 = vmul.f32 %v1433_v40, %v765_v30  ;;  %v790_v20 = vsub.f32 1.5, %v789_v46  ;;  %v839_v31 = vmul.f32 0.5, %v838_v41  ;;  %v828_v32 = vmul.f32 %v2368_v21, %v827_v34  ;;  %v277_v5 = vpop.xlane.xlu2 %276  ;;  %v1439_v41 = vld [vmem:[#allocation2 + $0x138] sm:$0xff] }
 0x10d   :  { %1232 = vst [vmem:[#allocation7 + $0x110] sm:$0xff] %v1168_v58  ;;  %v815_v24 = vsel %vm814_vm4, %v2326_v54, %v811_v47  ;;  %v801_v25 = vmul.f32 %v2336_v45, %v800_v48  ;;  %vm843_vm5 = vweird.f32 %v2353_v4  ;;  %v817_v44 = vmul.f32 %v2381_v2, %v2324_v26 }
 0x10e   :  { %v1167_v38 = vmul.f32 %v2262_v13, %v1099_v22  ;;  %v1104_v42 = vmul.f32 %v1434_v52, %v815_v24  ;;  %v791_v35 = vmul.f32 %v2345_v16, %v790_v20  ;;  %v840_v55 = vsub.f32 1.5, %v839_v31  ;;  %vm844_vm9 = vmor %vm842_vm14, %vm843_vm5 }
 0x10f   :  { %v805_v54 = vsel %vm804_vm6, %v2336_v45, %v801_v25  ;;  %v829_v37 = vmul.f32 0.5, %v828_v32  ;;  %vm833_vm8 = vweird.f32 %v2368_v21  ;;  %v818_v59 = vmul.f32 %v2381_v2, %v817_v44 }
 0x110   :  { %1231 = vst [vmem:[#allocation7 + $0x108] sm:$0xff] %v1167_v38  ;;  %v1172_v63 = vmul.f32 %v2262_v13, %v1104_v42  ;;  %v1103_v9 = vmul.f32 %v1435_v1, %v805_v54  ;;  %v795_v62 = vsel %vm794_vm7, %v2345_v16, %v791_v35  ;;  %v841_v45 = vmul.f32 %v2353_v4, %v840_v55  ;;  %vm834_vm11 = vmor %vm832_vm1, %vm833_vm8  ;;  %v273_v32 = vpop.xlane.xlu0 %272 }
 0x111   :  { %v1102_v17 = vmul.f32 %v1436_v12, %v795_v62  ;;  %v830_v50 = vsub.f32 1.5, %v829_v37  ;;  %v819_v23 = vmul.f32 0.5, %v818_v59  ;;  %1372 = vrsqrt.f32 %v2360_v29 }
 0x112   :  { %1236 = vst [vmem:[#allocation7 + $0x130] sm:$0xff] %v1172_v63  ;;  %v1171_v15 = vmul.f32 %v2262_v13, %v1103_v9  ;;  %v845_v3 = vsel %vm844_vm9, %v2353_v4, %v841_v45  ;;  %vm823_vm10 = vweird.f32 %v2381_v2  ;;  %v341_v16 = vmul.f32 0.0078125, %v2290_v18 }
 0x113   :  { %v1170_v28 = vmul.f32 %v2262_v13, %v1102_v17  ;;  %v1107_v43 = vmul.f32 %v1437_v10, %v845_v3  ;;  %v831_v7 = vmul.f32 %v2368_v21, %v830_v50  ;;  %v820_v14 = vsub.f32 1.5, %v819_v23 }
 0x114   :  { %1235 = vst [vmem:[#allocation7 + $0x128] sm:$0xff] %v1171_v15  ;;  %v2435_v4 = vadd.f32 1e-06, %v341_v16  ;;  %v340_v56 = vmul.f32 0.0078125, %v2306_v49  ;;  %v345_v18 = vmul.f32 0.0078125, %v2310_v60  ;;  %v344_v0 = vmul.f32 0.0078125, %v2351_v6  ;;  %v283_v25 = vpop.xlane.xlu2 %282 }
 0x115   :  { %1234 = vst [vmem:[#allocation7 + $0x120] sm:$0xff] %v1170_v28  ;;  %v1175_v33 = vmul.f32 %v2262_v13, %v1107_v43  ;;  %v835_v19 = vsel %vm834_vm11, %v2368_v21, %v831_v7  ;;  %v821_v57 = vmul.f32 %v2381_v2, %v820_v14  ;;  %vm822_vm12 = vweird.f32 %v2324_v26  ;;  %v1440_v15 = vld [vmem:[#allocation2 + $0x160] sm:$0xff] }
 0x116   :  { %v1106_v51 = vmul.f32 %v1438_v39, %v835_v19  ;;  %vm824_vm13 = vmor %vm822_vm12, %vm823_vm10  ;;  %1374 = vrsqrt.f32 %v2435_v4  ;;  %v2447_v49 = vadd.f32 1e-06, %v340_v56  ;;  %v343_v60 = vmul.f32 0.0078125, %v2375_v8  ;;  %v275_v8 = vpop.xlane.xlu1 %274 }
 0x117   :  { %v2450_v6 = vpop.eup %1372  ;;  %1239 = vst [vmem:[#allocation7 + $0x148] sm:$0xff] %v1175_v33  ;;  %v825_v21 = vsel %vm824_vm13, %v2381_v2, %v821_v57  ;;  %v2453_v11 = vadd.f32 1e-06, %v345_v18  ;;  %v2455_v53 = vadd.f32 1e-06, %v344_v0  ;;  %v348_v26 = vmul.f32 0.0078125, %v2379_v61 }
 0x118   :  { %v1174_v46 = vmul.f32 %v2262_v13, %v1106_v51  ;;  %v1105_v34 = vmul.f32 %v1439_v41, %v825_v21  ;;  %v867_v58 = vmul.f32 %v2450_v6, %v2360_v29  ;;  %1376 = vrsqrt.f32 %v2447_v49 }
 0x119   :  { %1378 = vrsqrt.f32 %v2453_v11  ;;  %v2465_v47 = vadd.f32 1e-06, %v343_v60  ;;  %v2468_v61 = vadd.f32 1e-06, %v348_v26  ;;  %v347_v48 = vmul.f32 0.0078125, %v269_v36  ;;  %v1441_v26 = vld [vmem:[#allocation2 + $0x158] sm:$0xff] }
 0x11a   :  { %1238 = vst [vmem:[#allocation7 + $0x140] sm:$0xff] %v1174_v46  ;;  %v1173_v30 = vmul.f32 %v2262_v13, %v1105_v34  ;;  %v868_v2 = vmul.f32 %v2450_v6, %v867_v58  ;;  %1380 = vrsqrt.f32 %v2455_v53  ;;  %v346_v40 = vmul.f32 0.0078125, %v267_v27 }
 0x11b   :  { %vm872_vm14 = vweird.f32 %v2360_v29  ;;  %1382 = vrsqrt.f32 %v2465_v47  ;;  %v351_v31 = vmul.f32 0.0078125, %v277_v5  ;;  %vm873_vm15 = vweird.f32 %v2450_v6 }
 0x11c   :  { %v2470_v22 = vpop.eup %1374  ;;  %1237 = vst [vmem:[#allocation7 + $0x138] sm:$0xff] %v1173_v30  ;;  %v869_v20 = vmul.f32 0.5, %v868_v2  ;;  %vm862_vm0 = vweird.f32 %v2435_v4  ;;  %1384 = vrsqrt.f32 %v2468_v61  ;;  %v2480_v38 = vadd.f32 1e-06, %v347_v48  ;;  %vm874_vm5 = vmor %vm872_vm14, %vm873_vm15  ;;  %v279_v2 = vpop.xlane.xlu0 %278 }
 0x11d   :  { %v857_v24 = vmul.f32 %v2470_v22, %v2435_v4  ;;  %vm863_vm1 = vweird.f32 %v2470_v22  ;;  %v2482_v52 = vadd.f32 1e-06, %v346_v40  ;;  %vm902_vm2 = vweird.f32 %v2453_v11 }
 0x11e   :  { %v870_v44 = vsub.f32 1.5, %v869_v20  ;;  %v2484_v42 = vpop.eup %1376  ;;  %v2488_v55 = vadd.f32 1e-06, %v351_v31  ;;  %v2490_v54 = vmul.f32 0.0078125, %v275_v8  ;;  %v2492_v37 = vmul.f32 0.0078125, %v273_v32  ;;  %v2528_v10 = vpop.xlane.xlu1 %280  ;;  %vm864_vm13 = vmor %vm862_vm0, %vm863_vm1  ;;  %v1442_v20 = vld [vmem:[#allocation2 + $0x150] sm:$0xff] }
 0x11f   :  { %v858_v35 = vmul.f32 %v2470_v22, %v857_v24  ;;  %v2494_v59 = vpop.eup %1378  ;;  %v847_v63 = vmul.f32 %v2484_v42, %v2447_v49  ;;  %vm852_vm3 = vweird.f32 %v2447_v49  ;;  %vm892_vm4 = vweird.f32 %v2455_v53 }
 0x120   :  { %v871_v36 = vmul.f32 %v2450_v6, %v870_v44  ;;  %1386 = vrsqrt.f32 %v2480_v38  ;;  %v2502_v1 = vmul.f32 0.0078125, %v283_v25  ;;  %v2504_v9 = vpop.eup %1380  ;;  %vm853_vm6 = vweird.f32 %v2484_v42  ;;  %v289_v44 = vpop.xlane.xlu2 %288 }
 0x121   :  { %v859_v62 = vmul.f32 0.5, %v858_v35  ;;  %v897_v45 = vmul.f32 %v2494_v59, %v2453_v11  ;;  %vm903_vm7 = vweird.f32 %v2494_v59  ;;  %v2514_v12 = vpop.eup %1382  ;;  %v848_v50 = vmul.f32 %v2484_v42, %v847_v63  ;;  %vm854_vm15 = vmor %vm852_vm3, %vm853_vm6 }
 0x122   :  { %v875_v17 = vsel %vm874_vm5, %v2450_v6, %v871_v36  ;;  %v887_v23 = vmul.f32 %v2504_v9, %v2455_v53  ;;  %vm893_vm8 = vweird.f32 %v2504_v9  ;;  %vm932_vm9 = vweird.f32 %v2468_v61  ;;  %v2522_v29 = vpop.eup %1384  ;;  %vm904_vm1 = vmor %vm902_vm2, %vm903_vm7  ;;  %v1444_v36 = vld [vmem:[#allocation2 + $0x170] sm:$0xff] }
 0x123   :  { %v1110_v3 = vmul.f32 %v1440_v15, %v875_v17  ;;  %v860_v16 = vsub.f32 1.5, %v859_v62  ;;  %v898_v27 = vmul.f32 %v2494_v59, %v897_v45  ;;  %v877_v28 = vmul.f32 %v2514_v12, %v2465_v47  ;;  %vm894_vm3 = vmor %vm892_vm4, %vm893_vm8  ;;  %v1445_v17 = vld [vmem:[#allocation2 + $0x168] sm:$0xff] }
 0x124   :  { %vm882_vm10 = vweird.f32 %v2465_v47  ;;  %v849_v43 = vmul.f32 0.5, %v848_v50  ;;  %v888_v7 = vmul.f32 %v2504_v9, %v887_v23  ;;  %vm883_vm11 = vweird.f32 %v2514_v12 }
 0x125   :  { %v927_v14 = vmul.f32 %v2522_v29, %v2468_v61  ;;  %v1178_v5 = vmul.f32 %v2262_v13, %v1110_v3  ;;  %v861_v56 = vmul.f32 %v2470_v22, %v860_v16  ;;  %v899_v18 = vmul.f32 0.5, %v898_v27  ;;  %vm884_vm2 = vmor %vm882_vm10, %vm883_vm11  ;;  %v1446_v3 = vld [vmem:[#allocation2 + $0x190] sm:$0xff] }
 0x126   :  { %v878_v0 = vmul.f32 %v2514_v12, %v877_v28  ;;  %vm922_vm12 = vweird.f32 %v2480_v38  ;;  %v2538_v33 = vpop.eup %1386  ;;  %v850_v19 = vsub.f32 1.5, %v849_v43  ;;  %v889_v57 = vmul.f32 0.5, %v888_v7  ;;  %v287_v45 = vpop.xlane.xlu1 %286 }
 0x127   :  { %v928_v39 = vmul.f32 %v2522_v29, %v927_v14  ;;  %vm933_vm14 = vweird.f32 %v2522_v29  ;;  %1242 = vst [vmem:[#allocation7 + $0x160] sm:$0xff] %v1178_v5  ;;  %v865_v51 = vsel %vm864_vm13, %v2470_v22, %v861_v56  ;;  %v900_v60 = vsub.f32 1.5, %v899_v18 }
 0x128   :  { %v879_v6 = vmul.f32 0.5, %v878_v0  ;;  %v917_v21 = vmul.f32 %v2538_v33, %v2480_v38  ;;  %v1109_v46 = vmul.f32 %v1441_v26, %v865_v51  ;;  %v851_v41 = vmul.f32 %v2484_v42, %v850_v19  ;;  %vm934_vm4 = vmor %vm932_vm9, %vm933_vm14  ;;  %v1447_v38 = vld [vmem:[#allocation2 + $0x188] sm:$0xff] }
 0x129   :  { %v890_v4 = vsub.f32 1.5, %v889_v57  ;;  %v929_v34 = vmul.f32 0.5, %v928_v39  ;;  %v901_v58 = vmul.f32 %v2494_v59, %v900_v60  ;;  %vm923_vm0 = vweird.f32 %v2538_v33  ;;  %v295_v39 = vpop.xlane.xlu2 %294 }
 0x12a   :  { %v880_v8 = vsub.f32 1.5, %v879_v6  ;;  %v918_v30 = vmul.f32 %v2538_v33, %v917_v21  ;;  %v1177_v48 = vmul.f32 %v2262_v13, %v1109_v46  ;;  %v855_v40 = vsel %vm854_vm15, %v2484_v42, %v851_v41  ;;  %v1443_v42 = vld [vmem:[#allocation2 + $0x178] sm:$0xff]  ;;  %vm924_vm5 = vmor %vm922_vm12, %vm923_vm0 }
 0x12b   :  { %v891_v49 = vmul.f32 %v2504_v9, %v890_v4  ;;  %v930_v22 = vsub.f32 1.5, %v929_v34  ;;  %v1108_v31 = vmul.f32 %v1442_v20, %v855_v40  ;;  %v905_v32 = vsel %vm904_vm1, %v2494_v59, %v901_v58 }
 0x12c   :  { %v881_v24 = vmul.f32 %v2514_v12, %v880_v8  ;;  %v919_v25 = vmul.f32 0.5, %v918_v30  ;;  %1241 = vst [vmem:[#allocation7 + $0x158] sm:$0xff] %v1177_v48  ;;  %v1113_v11 = vmul.f32 %v1443_v42, %v905_v32  ;;  %1388 = vrsqrt.f32 %v2482_v52 }
 0x12d   :  { %v895_v35 = vsel %vm894_vm3, %v2504_v9, %v891_v49  ;;  %v931_v59 = vmul.f32 %v2522_v29, %v930_v22  ;;  %v1176_v53 = vmul.f32 %v2262_v13, %v1108_v31  ;;  %1390 = vrsqrt.f32 %v2488_v55 }
 0x12e   :  { %v1112_v63 = vmul.f32 %v1444_v36, %v895_v35  ;;  %v885_v62 = vsel %vm884_vm2, %v2514_v12, %v881_v24  ;;  %v920_v9 = vsub.f32 1.5, %v919_v25  ;;  %v1181_v47 = vmul.f32 %v2262_v13, %v1113_v11  ;;  %v293_v26 = vpop.xlane.xlu1 %292  ;;  %v1448_v36 = vld [vmem:[#allocation2 + $0x180] sm:$0xff] }
 0x12f   :  { %v1111_v50 = vmul.f32 %v1445_v17, %v885_v62  ;;  %v935_v23 = vsel %vm934_vm4, %v2522_v29, %v931_v59  ;;  %1240 = vst [vmem:[#allocation7 + $0x150] sm:$0xff] %v1176_v53  ;;  %v2594_v27 = vadd.f32 1e-06, %v2490_v54  ;;  %v2597_v29 = vadd.f32 1e-06, %v2492_v37  ;;  %v285_v37 = vpop.xlane.xlu0 %284 }
 0x130   :  { %v1180_v15 = vmul.f32 %v2262_v13, %v1112_v63  ;;  %v1116_v16 = vmul.f32 %v1446_v3, %v935_v23  ;;  %v921_v12 = vmul.f32 %v2538_v33, %v920_v9  ;;  %1245 = vst [vmem:[#allocation7 + $0x178] sm:$0xff] %v1181_v47  ;;  %v2602_v7 = vadd.f32 1e-06, %v2502_v1 }
 0x131   :  { %v1179_v61 = vmul.f32 %v2262_v13, %v1111_v50  ;;  %v353_v14 = vmul.f32 0.0078125, %v2528_v10  ;;  %1392 = vrsqrt.f32 %v2594_v27  ;;  %v352_v10 = vmul.f32 0.0078125, %v279_v2 }
 0x132   :  { %1244 = vst [vmem:[#allocation7 + $0x170] sm:$0xff] %v1180_v15  ;;  %v1184_v28 = vmul.f32 %v2262_v13, %v1116_v16  ;;  %v925_v43 = vsel %vm924_vm5, %v2538_v33, %v921_v12  ;;  %v2605_v5 = vpop.eup %1388  ;;  %1394 = vrsqrt.f32 %v2597_v29  ;;  %vm912_vm6 = vweird.f32 %v2482_v52  ;;  %v1449_v12 = vld [vmem:[#allocation2 + $0x1a8] sm:$0xff] }
 0x133   :  { %1243 = vst [vmem:[#allocation7 + $0x168] sm:$0xff] %v1179_v61  ;;  %v1115_v56 = vmul.f32 %v1447_v38, %v925_v43  ;;  %v907_v54 = vmul.f32 %v2605_v5, %v2482_v52  ;;  %1396 = vrsqrt.f32 %v2602_v7  ;;  %v2613_v1 = vadd.f32 1e-06, %v353_v14  ;;  %v2615_v0 = vpop.eup %1390 }
 0x134   :  { %1248 = vst [vmem:[#allocation7 + $0x190] sm:$0xff] %v1184_v28  ;;  %v357_v19 = vmul.f32 0.0078125, %v289_v44  ;;  %v356_v57 = vmul.f32 0.0078125, %v287_v45  ;;  %v957_v51 = vmul.f32 %v2615_v0, %v2488_v55  ;;  %vm962_vm7 = vweird.f32 %v2488_v55 }
 0x135   :  { %v1183_v18 = vmul.f32 %v2262_v13, %v1115_v56  ;;  %v908_v33 = vmul.f32 %v2605_v5, %v907_v54  ;;  %1398 = vrsqrt.f32 %v2613_v1  ;;  %v355_v60 = vmul.f32 0.0078125, %v285_v37 }
 0x136   :  { %vm913_vm8 = vweird.f32 %v2605_v5  ;;  %vm952_vm9 = vweird.f32 %v2594_v27  ;;  %v2625_v21 = vadd.f32 1e-06, %v352_v10  ;;  %v958_v41 = vmul.f32 %v2615_v0, %v957_v51 }
 0x137   :  { %1247 = vst [vmem:[#allocation7 + $0x188] sm:$0xff] %v1183_v18  ;;  %v909_v6 = vmul.f32 0.5, %v908_v33  ;;  %v2627_v46 = vpop.eup %1392  ;;  %vm963_vm10 = vweird.f32 %v2615_v0  ;;  %v2631_v4 = vadd.f32 1e-06, %v357_v19  ;;  %v2633_v34 = vmul.f32 0.0078125, %v295_v39  ;;  %vm914_vm15 = vmor %vm912_vm6, %vm913_vm8  ;;  %v2685_v16 = vpop.xlane.xlu0 %290  ;;  %v1450_v18 = vld [vmem:[#allocation2 + $0x1a0] sm:$0xff] }
 0x138   :  { %v2635_v58 = vpop.eup %1394  ;;  %v947_v30 = vmul.f32 %v2627_v46, %v2594_v27  ;;  %vm992_vm11 = vweird.f32 %v2602_v7  ;;  %1400 = vrsqrt.f32 %v2625_v21  ;;  %v2641_v2 = vadd.f32 1e-06, %v356_v57  ;;  %vm964_vm3 = vmor %vm962_vm7, %vm963_vm10 }
 0x139   :  { %v910_v8 = vsub.f32 1.5, %v909_v6  ;;  %v2643_v48 = vpop.eup %1396  ;;  %v959_v40 = vmul.f32 0.5, %v958_v41  ;;  %v937_v49 = vmul.f32 %v2635_v58, %v2597_v29  ;;  %vm942_vm12 = vweird.f32 %v2597_v29  ;;  %v1451_v29 = vld [vmem:[#allocation2 + $0x198] sm:$0xff] }
 0x13a   :  { %v2648_v22 = vadd.f32 1e-06, %v355_v60  ;;  %v2650_v20 = vmul.f32 0.0078125, %v293_v26  ;;  %v948_v32 = vmul.f32 %v2627_v46, %v947_v30  ;;  %vm953_vm13 = vweird.f32 %v2627_v46  ;;  %v1452_v26 = vld [vmem:[#allocation2 + $0x1c0] sm:$0xff] }
 0x13b   :  { %v911_v31 = vmul.f32 %v2605_v5, %v910_v8  ;;  %v987_v24 = vmul.f32 %v2643_v48, %v2602_v7  ;;  %vm982_vm14 = vweird.f32 %v2613_v1  ;;  %v2658_v25 = vpop.eup %1398  ;;  %v960_v44 = vsub.f32 1.5, %v959_v40  ;;  %vm954_vm2 = vmor %vm952_vm9, %vm953_vm13  ;;  %v1453_v40 = vld [vmem:[#allocation2 + $0x1b8] sm:$0xff] }
 0x13c   :  { %v938_v42 = vmul.f32 %v2635_v58, %v937_v49  ;;  %vm943_vm0 = vweird.f32 %v2635_v58  ;;  %1402 = vrsqrt.f32 %v2631_v4  ;;  %v949_v35 = vmul.f32 0.5, %v948_v32 }
 0x13d   :  { %v915_v11 = vsel %vm914_vm15, %v2605_v5, %v911_v31  ;;  %v988_v59 = vmul.f32 %v2643_v48, %v987_v24  ;;  %v977_v53 = vmul.f32 %v2658_v25, %v2613_v1  ;;  %v961_v52 = vmul.f32 %v2615_v0, %v960_v44  ;;  %vm944_vm6 = vmor %vm942_vm12, %vm943_vm0 }
 0x13e   :  { %v1114_v63 = vmul.f32 %v1448_v36, %v915_v11  ;;  %v939_v62 = vmul.f32 0.5, %v938_v42  ;;  %vm993_vm1 = vweird.f32 %v2643_v48  ;;  %v2673_v9 = vpop.eup %1400  ;;  %v950_v45 = vsub.f32 1.5, %v949_v35  ;;  %v1454_v35 = vld [vmem:[#allocation2 + $0x1b0] sm:$0xff] }
 0x13f   :  { %v989_v47 = vmul.f32 0.5, %v988_v59  ;;  %v978_v17 = vmul.f32 %v2658_v25, %v977_v53  ;;  %1404 = vrsqrt.f32 %v2641_v2  ;;  %v965_v23 = vsel %vm964_vm3, %v2615_v0, %v961_v52  ;;  %vm994_vm7 = vmor %vm992_vm11, %vm993_vm1 }
 0x140   :  { %v1182_v50 = vmul.f32 %v2262_v13, %v1114_v63  ;;  %v940_v15 = vsub.f32 1.5, %v939_v62  ;;  %v967_v3 = vmul.f32 %v2673_v9, %v2625_v21  ;;  %v1119_v61 = vmul.f32 %v1449_v12, %v965_v23 }
 0x141   :  { %v951_v55 = vmul.f32 %v2627_v46, %v950_v45  ;;  %v990_v28 = vsub.f32 1.5, %v989_v47  ;;  %v979_v43 = vmul.f32 0.5, %v978_v17  ;;  %vm983_vm4 = vweird.f32 %v2658_v25  ;;  %v1455_v47 = vld [vmem:[#allocation2 + $0x1d8] sm:$0xff] }
 0x142   :  { %v2688_v14 = vpop.eup %1402  ;;  %1246 = vst [vmem:[#allocation7 + $0x180] sm:$0xff] %v1182_v50  ;;  %v941_v5 = vmul.f32 %v2635_v58, %v940_v15  ;;  %v968_v38 = vmul.f32 %v2673_v9, %v967_v3  ;;  %vm972_vm5 = vweird.f32 %v2625_v21  ;;  %v1187_v56 = vmul.f32 %v2262_v13, %v1119_v61  ;;  %vm984_vm9 = vmor %vm982_vm14, %vm983_vm4  ;;  %v297_v21 = vpop.xlane.xlu0 %296  ;;  %v1456_v61 = vld [vmem:[#allocation2 + $0x1d0] sm:$0xff] }
 0x143   :  { %v955_v54 = vsel %vm954_vm2, %v2627_v46, %v951_v55  ;;  %v991_v27 = vmul.f32 %v2643_v48, %v990_v28  ;;  %v980_v37 = vsub.f32 1.5, %v979_v43  ;;  %v1017_v19 = vmul.f32 %v2688_v14, %v2631_v4 }
 0x144   :  { %v1118_v10 = vmul.f32 %v1450_v18, %v955_v54  ;;  %v945_v0 = vsel %vm944_vm6, %v2635_v58, %v941_v5  ;;  %v969_v33 = vmul.f32 0.5, %v968_v38  ;;  %1251 = vst [vmem:[#allocation7 + $0x1a8] sm:$0xff] %v1187_v56  ;;  %vm973_vm8 = vweird.f32 %v2673_v9 }
 0x145   :  { %v2712_v57 = vpop.eup %1404  ;;  %v1117_v39 = vmul.f32 %v1451_v29, %v945_v0  ;;  %v995_v51 = vsel %vm994_vm7, %v2643_v48, %v991_v27  ;;  %v981_v60 = vmul.f32 %v2658_v25, %v980_v37  ;;  %v1018_v41 = vmul.f32 %v2688_v14, %v1017_v19  ;;  %vm974_vm11 = vmor %vm972_vm5, %vm973_vm8 }
 0x146   :  { %v1186_v6 = vmul.f32 %v2262_v13, %v1118_v10  ;;  %v1122_v7 = vmul.f32 %v1452_v26, %v995_v51  ;;  %v970_v46 = vsub.f32 1.5, %v969_v33  ;;  %vm1022_vm10 = vweird.f32 %v2631_v4 }
 0x147   :  { %v1185_v58 = vmul.f32 %v2262_v13, %v1117_v39  ;;  %v985_v8 = vsel %vm984_vm9, %v2658_v25, %v981_v60  ;;  %v1007_v30 = vmul.f32 %v2712_v57, %v2641_v2  ;;  %v1019_v31 = vmul.f32 0.5, %v1018_v41 }
 0x148   :  { %1250 = vst [vmem:[#allocation7 + $0x1a0] sm:$0xff] %v1186_v6  ;;  %v1190_v48 = vmul.f32 %v2262_v13, %v1122_v7  ;;  %v1121_v49 = vmul.f32 %v1453_v40, %v985_v8  ;;  %v971_v1 = vmul.f32 %v2673_v9, %v970_v46  ;;  %vm1023_vm12 = vweird.f32 %v2688_v14 }
 0x149   :  { %1249 = vst [vmem:[#allocation7 + $0x198] sm:$0xff] %v1185_v58  ;;  %v1008_v32 = vmul.f32 %v2712_v57, %v1007_v30  ;;  %1406 = vrsqrt.f32 %v2648_v22  ;;  %v2738_v24 = vadd.f32 1e-06, %v2633_v34  ;;  %v1020_v42 = vsub.f32 1.5, %v1019_v31  ;;  %vm1024_vm14 = vmor %vm1022_vm10, %vm1023_vm12  ;;  %v1458_v30 = vld [vmem:[#allocation2 + $0x1f0] sm:$0xff] }
 0x14a   :  { %1254 = vst [vmem:[#allocation7 + $0x1c0] sm:$0xff] %v1190_v48  ;;  %v1189_v25 = vmul.f32 %v2262_v13, %v1121_v49  ;;  %v975_v44 = vsel %vm974_vm11, %v2673_v9, %v971_v1  ;;  %v2743_v11 = vadd.f32 1e-06, %v2650_v20  ;;  %vm1012_vm13 = vweird.f32 %v2641_v2  ;;  %v1459_v1 = vld [vmem:[#allocation2 + $0x1e8] sm:$0xff] }
 0x14b   :  { %v1120_v59 = vmul.f32 %v1454_v35, %v975_v44  ;;  %v1009_v53 = vmul.f32 0.5, %v1008_v32  ;;  %1408 = vrsqrt.f32 %v2738_v24  ;;  %v1021_v36 = vmul.f32 %v2688_v14, %v1020_v42  ;;  %v1460_v44 = vld [vmem:[#allocation5] ss:$0 sm:$0xff] }
 0x14c   :  { %1253 = vst [vmem:[#allocation7 + $0x1b8] sm:$0xff] %v1189_v25  ;;  %1410 = vrsqrt.f32 %v2743_v11  ;;  %v358_v34 = vmul.f32 0.0078125, %v2685_v16  ;;  %vm1013_vm15 = vweird.f32 %v2712_v57  ;;  %v361_v52 = vmul.f32 0.0078125, %v297_v21  ;;  %v1461_v35 = vld [vmem:[#allocation2 + $0x1e0] sm:$0xff] }
 0x14d   :  { %v1188_v63 = vmul.f32 %v2262_v13, %v1120_v59  ;;  %v1010_v20 = vsub.f32 1.5, %v1009_v53  ;;  %v1025_v62 = vsel %vm1024_vm14, %v2688_v14, %v1021_v36  ;;  %vm1014_vm0 = vmor %vm1012_vm13, %vm1013_vm15  ;;  %vm1002_vm3 = vweird.f32 %v2648_v22 }
 0x14e   :  { %v2757_v9 = vadd.f32 1e-06, %v358_v34  ;;  %v1125_v17 = vmul.f32 %v1455_v47, %v1025_v62  ;;  %v2760_v23 = vadd.f32 1e-06, %v361_v52  ;;  %vm1052_vm2 = vweird.f32 %v2738_v24 }
 0x14f   :  { %v1407_v45 = vpop.eup %1406  ;;  %1252 = vst [vmem:[#allocation7 + $0x1b0] sm:$0xff] %v1188_v63  ;;  %v1011_v50 = vmul.f32 %v2712_v57, %v1010_v20  ;;  %vm1042_vm6 = vweird.f32 %v2743_v11 }
 0x150   :  { %v997_v4 = vmul.f32 %v1407_v45, %v2648_v22  ;;  %1412 = vrsqrt.f32 %v2757_v9  ;;  %v1193_v3 = vmul.f32 %v2262_v13, %v1125_v17  ;;  %vm1003_vm1 = vweird.f32 %v1407_v45  ;;  %v1457_v22 = vld [vmem:[#allocation2 + $0x1c8] sm:$0xff] }
 0x151   :  { %v1409_v15 = vpop.eup %1408  ;;  %v1015_v16 = vsel %vm1014_vm0, %v2712_v57, %v1011_v50  ;;  %1414 = vrsqrt.f32 %v2760_v23  ;;  %vm1004_vm5 = vmor %vm1002_vm3, %vm1003_vm1  ;;  %vm1032_vm12 = vweird.f32 %v2757_v9  ;;  %vm1062_vm14 = vweird.f32 %v2760_v23 }
 0x152   :  { %v1411_v12 = vpop.eup %1410  ;;  %v1124_v55 = vmul.f32 %v1456_v61, %v1015_v16  ;;  %v998_v28 = vmul.f32 %v1407_v45, %v997_v4  ;;  %v1047_v43 = vmul.f32 %v1409_v15, %v2738_v24  ;;  %1257 = vst [vmem:[#allocation7 + $0x1d8] sm:$0xff] %v1193_v3  ;;  %vm1053_vm4 = vweird.f32 %v1409_v15 }
 0x153   :  { %v1037_v2 = vmul.f32 %v1411_v12, %v2743_v11  ;;  %vm1043_vm7 = vweird.f32 %v1411_v12  ;;  %vm1054_vm8 = vmor %vm1052_vm2, %vm1053_vm4 }
 0x154   :  { %v1192_v14 = vmul.f32 %v2262_v13, %v1124_v55  ;;  %v999_v5 = vmul.f32 0.5, %v998_v28  ;;  %v1048_v38 = vmul.f32 %v1409_v15, %v1047_v43  ;;  %vm1044_vm9 = vmor %vm1042_vm6, %vm1043_vm7 }
 0x155   :  { %v1038_v56 = vmul.f32 %v1411_v12, %v1037_v2 }
 0x156   :  { %v1413_v54 = vpop.eup %1412  ;;  %1256 = vst [vmem:[#allocation7 + $0x1d0] sm:$0xff] %v1192_v14  ;;  %v1000_v27 = vsub.f32 1.5, %v999_v5  ;;  %v1049_v37 = vmul.f32 0.5, %v1048_v38 }
 0x157   :  { %v1415_v18 = vpop.eup %1414  ;;  %v1039_v10 = vmul.f32 0.5, %v1038_v56  ;;  %v1027_v0 = vmul.f32 %v1413_v54, %v2757_v9  ;;  %vm1033_vm10 = vweird.f32 %v1413_v54 }
 0x158   :  { %v1001_v33 = vmul.f32 %v1407_v45, %v1000_v27  ;;  %v1050_v19 = vsub.f32 1.5, %v1049_v37  ;;  %v1057_v57 = vmul.f32 %v1415_v18, %v2760_v23  ;;  %vm1063_vm11 = vweird.f32 %v1415_v18  ;;  %vm1034_vm13 = vmor %vm1032_vm12, %vm1033_vm10 }
 0x159   :  { %v1040_v29 = vsub.f32 1.5, %v1039_v10  ;;  %v1028_v39 = vmul.f32 %v1413_v54, %v1027_v0  ;;  %vm1064_vm15 = vmor %vm1062_vm14, %vm1063_vm11 }
 0x15a   :  { %v1005_v51 = vsel %vm1004_vm5, %v1407_v45, %v1001_v33  ;;  %v1051_v60 = vmul.f32 %v1409_v15, %v1050_v19  ;;  %v1058_v6 = vmul.f32 %v1415_v18, %v1057_v57 }
 0x15b   :  { %v1123_v26 = vmul.f32 %v1457_v22, %v1005_v51  ;;  %v1041_v7 = vmul.f32 %v1411_v12, %v1040_v29  ;;  %v1029_v46 = vmul.f32 0.5, %v1028_v39 }
 0x15c   :  { %v1055_v41 = vsel %vm1054_vm8, %v1409_v15, %v1051_v60  ;;  %v1059_v58 = vmul.f32 0.5, %v1058_v6 }
 0x15d   :  { %v1191_v8 = vmul.f32 %v2262_v13, %v1123_v26  ;;  %v1128_v48 = vmul.f32 %v1458_v30, %v1055_v41  ;;  %v1045_v40 = vsel %vm1044_vm9, %v1411_v12, %v1041_v7  ;;  %v1030_v49 = vsub.f32 1.5, %v1029_v46 }
 0x15e   :  { %v1127_v31 = vmul.f32 %v1459_v1, %v1045_v40  ;;  %v1060_v32 = vsub.f32 1.5, %v1059_v58 }
 0x15f   :  { %1255 = vst [vmem:[#allocation7 + $0x1c8] sm:$0xff] %v1191_v8  ;;  %v1196_v24 = vmul.f32 %v2262_v13, %v1128_v48  ;;  %v1031_v25 = vmul.f32 %v1413_v54, %v1030_v49  ;;  %v1462_v13 = vld [vmem:[#allocation2 + $0x1f8] sm:$0xff] }
 0x160   :  { %v1195_v42 = vmul.f32 %v1460_v44, %v1127_v31  ;;  %v1061_v11 = vmul.f32 %v1415_v18, %v1060_v32 }
 0x161   :  { %1260 = vst [vmem:[#allocation7 + $0x1f0] sm:$0xff] %v1196_v24  ;;  %v1035_v21 = vsel %vm1034_vm13, %v1413_v54, %v1031_v25 }
 0x162   :  { %1259 = vst [vmem:[#allocation7 + $0x1e8] sm:$0xff] %v1195_v42  ;;  %v1126_v59 = vmul.f32 %v1461_v35, %v1035_v21  ;;  %v1065_v53 = vsel %vm1064_vm15, %v1415_v18, %v1061_v11 }
 0x163   :  { %v1129_v36 = vmul.f32 %v1462_v13, %v1065_v53 }
 0x164   :  { %v1194_v34 = vmul.f32 %v1460_v44, %v1126_v59 }
 0x165   :  { %v1197_v63 = vmul.f32 %v1460_v44, %v1129_v36 }
 0x166   :  { %1258 = vst [vmem:[#allocation7 + $0x1e0] sm:$0xff] %v1194_v34 }
 0x167   :  { %1261 = vst [vmem:[#allocation7 + $0x1f8] sm:$0xff] %v1197_v63 }
 0x168   :  { %1274 = dma.vmem_to_hbm [thread:$0]  %s1267_s1, 8192, %s1269_s23, [#allocation4], %s1542_s17, %s1542_s17, %s1543_s18  }
 0x169   :  { %1539 = dma.done.wait [#allocation4], 8192  }
 0x16a   :  { %1540 = vsyncadd [#allocation4], 4294959104 }
 0x16b   :  { %1279 = vsyncpa [#allocation3], 1 }
 0x16c   :  { %1280 = vsyncpa [#allocation6], 1 }
 0x16d   :  { %1281 = vsyncpa [#allocation4], 1 }

</bundles_post_ra>
